<compile_context>
chip_gen: v7x
topology: tpu7x:2x2x1
jax: 0.10.0
libtpu: 0.0.40
codegen_flags: <defaults>
</compile_context>

<pallas_src>
import functools

import jax
import jax.numpy as jnp
import numpy as np
from jax.experimental import pallas as pl
from jax.experimental.pallas import tpu as pltpu

EPS = 1e-5          # PyTorch BatchNorm default eps
N_BLOCKS = 4        # non_local1..4


def _round_up(n, m):
    return ((n + m - 1) // m) * m


def _layout(F, E, Ci):
    """Static row offsets inside the packed parameter slabs (pure Python)."""
    F2, F4 = 2 * F, 4 * F
    lane = max(F4, 128)

    # ---- weight slab: (w_rows, lane) ----
    w = {}
    r = 0
    for name, rows in (('enc_w1', F), ('enc_w2', F2), ('enc_w3', F4),
                       ('dec_w1', F4), ('dec_w2', F2), ('w_fold', F)):
        w[name] = r
        r += _round_up(rows, 8)
    nl_w = []
    for _ in range(N_BLOCKS):
        pw_off = r
        r += _round_up(Ci + 2, 8)
        zw_off = r
        r += _round_up(E, 8)
        nl_w.append((pw_off, zw_off))
    w_rows = _round_up(r, 8)

    # ---- column-param slab: (c_rows, 1) ----
    c = {}
    s = 0
    for name in ('enc_g1', 'enc_be1', 'enc_g2', 'enc_be2', 'dec_g1', 'dec_be1'):
        c[name] = s
        s += _round_up(E, 8)
    nl_c = []
    for _ in range(N_BLOCKS):
        pb_off = s
        s += _round_up(Ci + 2, 8)
        zb_off = s
        s += _round_up(E, 8)
        g_off = s
        s += _round_up(E, 8)
        b_off = s
        s += _round_up(E, 8)
        nl_c.append((pb_off, zb_off, g_off, b_off))
    c_rows = _round_up(s, 8)

    return dict(w=w, nl_w=nl_w, w_rows=w_rows, c=c, nl_c=nl_c, c_rows=c_rows,
                lane=lane)


# ---------------------------------------------------------------------------
# Single fused kernel
# ---------------------------------------------------------------------------
def _relation_disc_kernel(x_ref, w_ref, rb_ref, cp_ref, out_ref, *, F, E, Ci):
    B = x_ref.shape[0]
    F2, F4 = 2 * F, 4 * F
    T = F4
    L = _layout(F, E, Ci)
    wo, nlw = L['w'], L['nl_w']
    co, nlc = L['c'], L['nl_c']

    rb = rb_ref[...]          # (8, lane)   packed row biases
    cp = cp_ref[...]          # (c_rows, 1) packed per-channel params

    def wslice(name, rows, cols):
        o = wo[name]
        return w_ref[o:o + rows, 0:cols]

    def bias_row(i, n):
        return rb[i:i + 1, 0:n]                     # (1, n)

    def col(off, n):
        return cp[off:off + n, :]                   # (n, 1)

    def bn_rows(h2d, g_off, b_off):
        """BatchNorm1d(E) on (B*E, C) rows (b-major), training-mode, single-pass."""
        C = h2d.shape[-1]
        h3 = h2d.reshape(B, E, C)
        m = jnp.mean(h3, axis=(0, 2), keepdims=True)
        ms = jnp.mean(h3 * h3, axis=(0, 2), keepdims=True)
        inv = jax.lax.rsqrt(ms - m * m + EPS)
        g = col(g_off, E).reshape(1, E, 1)
        b = col(b_off, E).reshape(1, E, 1)
        return ((h3 - m) * inv * g + b).reshape(B * E, C)

    # ------------------------------- encoder -------------------------------
    x2d = x_ref[...].reshape(B * E, F)
    h = jnp.dot(x2d, wslice('enc_w1', F, F2),
                preferred_element_type=jnp.float32) + bias_row(0, F2)
    h = jnp.maximum(bn_rows(h, co['enc_g1'], co['enc_be1']), 0.0)
    h = jnp.dot(h, wslice('enc_w2', F2, F4),
                preferred_element_type=jnp.float32) + bias_row(1, F4)
    h = jnp.maximum(bn_rows(h, co['enc_g2'], co['enc_be2']), 0.0)
    h = jax.nn.sigmoid(jnp.dot(h, wslice('enc_w3', F4, F4),
                               preferred_element_type=jnp.float32) + bias_row(2, F4))

    # ---- re-pack (B*E, T) -> (E, B*T): aligned lane-concat, no relayout ----
    hn = jnp.concatenate([h[b * E:(b + 1) * E, :] for b in range(B)], axis=1)

    # ------------- 4 non-local blocks, batched over B in (E, B*T) ----------
    inv_T = 1.0 / T
    for blk in range(N_BLOCKS):
        pw_off, zw_off = nlw[blk]
        pb_off, zb_off, g_off, be_off = nlc[blk]
        pw = w_ref[pw_off:pw_off + (Ci + 2), 0:E]      # fused g|theta|phi (Ci+2, E)
        zwT = w_ref[zw_off:zw_off + E, 0:Ci]           # W_z weight, transposed (E, Ci)
        pb = col(pb_off, Ci + 2)                       # (Ci+2, 1)
        zb = col(zb_off, E)                            # (E, 1)
        gamma = col(g_off, E)                          # (E, 1)
        beta = col(be_off, E)                          # (E, 1)

        # one fused 1x1-conv projection over the whole batch (N = B*T)
        proj = jnp.dot(pw, hn, preferred_element_type=jnp.float32) + pb   # (Ci+2, B*T)
        g_x = proj[0:Ci, :]                            # (Ci, B*T)
        theta = proj[Ci:Ci + 1, :]                     # (1, B*T) (W_f bias folded in)
        phi_c = jnp.transpose(proj[Ci + 1:Ci + 2, :])  # (B*T, 1): ONE transpose/block

        # concatenate-mode pairwise f + aggregation; only the (T,T) piece is per-b
        y_parts = []
        for b in range(B):
            # f_t[j, i] = relu(phi_b[j] + theta_b[i])  ==  f[b, i, j] of the module
            f_t = jnp.maximum(phi_c[b * T:(b + 1) * T, :]
                              + theta[:, b * T:(b + 1) * T], 0.0)          # (T, T)
            y_parts.append(jnp.dot(g_x[:, b * T:(b + 1) * T], f_t,
                                   preferred_element_type=jnp.float32))    # (Ci, T)
        y = jnp.concatenate(y_parts, axis=1) * inv_T                        # (Ci, B*T)

        # W_z 1x1 conv (Ci -> E) over the whole batch
        wz = jnp.dot(zwT, y, preferred_element_type=jnp.float32) + zb       # (E, B*T)

        # W_z BatchNorm1d(E): per-channel over (batch, T); single-pass stats
        m = jnp.mean(wz, axis=1, keepdims=True)
        ms = jnp.mean(wz * wz, axis=1, keepdims=True)
        inv = jax.lax.rsqrt(ms - m * m + EPS)
        hn = (wz - m) * inv * gamma + beta + hn        # BN + residual

    # -------------------------- decoder + head ------------------------------
    h = jnp.concatenate([hn[:, b * T:(b + 1) * T] for b in range(B)], axis=0)  # (B*E, T)
    h = jnp.dot(h, wslice('dec_w1', F4, F2),
                preferred_element_type=jnp.float32) + bias_row(3, F2)
    h = jnp.maximum(bn_rows(h, co['dec_g1'], co['dec_be1']), 0.0)
    h = jnp.maximum(jnp.dot(h, wslice('dec_w2', F2, F),
                            preferred_element_type=jnp.float32) + bias_row(4, F), 0.0)

    # branch_fc1 | branch_fc2 | logits folded into one (F,1) head at pack time.
    # (Take an 8-lane weight slice -- lanes 1..7 are zero -- and keep column 0,
    #  avoiding an N=1 matmul corner case.)
    logit = jnp.dot(h, wslice('w_fold', F, 8),
                    preferred_element_type=jnp.float32)[:, 0:1] + rb[5:6, 0:1]
    out_ref[...] = jax.nn.sigmoid(logit)               # (B*E, 1)


# ---------------------------------------------------------------------------
# Wrapper
# ---------------------------------------------------------------------------
def relation_discriminator_forward(x, kp):
    B, E, F = x.shape
    Ci = max(E // 2, 1)
    kernel = functools.partial(_relation_disc_kernel, F=F, E=E, Ci=Ci)
    out = pl.pallas_call(
        kernel,
        out_shape=jax.ShapeDtypeStruct((B * E, 1), jnp.float32),
        in_specs=[pl.BlockSpec(memory_space=pltpu.MemorySpace.VMEM)] * 4,
        out_specs=pl.BlockSpec(memory_space=pltpu.MemorySpace.VMEM),
    )(x, kp['w_slab'], kp['row_b'], kp['col_p'])
    return out.reshape(B, E, 1)     # keep the module's (B, E, 1) output shape


# ---------------------------------------------------------------------------
# Deterministic synthetic parameters (shapes follow the module's __init__)
# ---------------------------------------------------------------------------
def init_raw_params(key, feature_size, class_num, element_num):
    F, E, CN = feature_size, element_num, class_num
    F2, F4 = 2 * F, 4 * F
    Ci = max(E // 2, 1)
    keys = iter(jax.random.split(key, 64))

    def lin(fan_in, fan_out):
        bound = 1.0 / np.sqrt(fan_in)
        w = jax.random.uniform(next(keys), (fan_in, fan_out), jnp.float32, -bound, bound)
        b = jax.random.uniform(next(keys), (fan_out,), jnp.float32, -bound, bound)
        return w, b

    ones, zeros = jnp.ones((E,), jnp.float32), jnp.zeros((E,), jnp.float32)

    p = {}
    p['enc_w1'], p['enc_b1'] = lin(F, F2)
    p['enc_g1'], p['enc_be1'] = ones, zeros
    p['enc_w2'], p['enc_b2'] = lin(F2, F4)
    p['enc_g2'], p['enc_be2'] = ones, zeros
    p['enc_w3'], p['enc_b3'] = lin(F4, F4)

    p['nl'] = []
    for _ in range(N_BLOCKS):
        blk = {}
        blk['gw'], blk['gb'] = lin(E, Ci)        # g:     conv1d(E -> Ci, k=1)  (in, out)
        blk['tw'], blk['tb'] = lin(E, Ci)        # theta
        blk['pw'], blk['pb'] = lin(E, Ci)        # phi
        blk['wf'], blk['wfb'] = lin(2 * Ci, 1)   # W_f:   conv2d(2Ci -> 1, k=1)
        blk['zw'], blk['zb'] = lin(Ci, E)        # W_z:   conv1d(Ci -> E, k=1)
        blk['bng'], blk['bnb'] = ones, zeros     # W_z BatchNorm1d(E) (gamma=1, see TODO)
        p['nl'].append(blk)

    p['dec_w1'], p['dec_b1'] = lin(F4, F2)
    p['dec_g1'], p['dec_be1'] = ones, zeros
    p['dec_w2'], p['dec_b2'] = lin(F2, F)
    p['cls_w'], p['cls_b'] = lin(F, CN)
    p['geo_w'], p['geo_b'] = lin(F, F - CN)
    p['log_w'], p['log_b'] = lin(F, 1)
    return p


def pack_params(p):
    """Fold/fuse raw parameters into the 3 slabs the fused kernel reads."""
    F = p['enc_w1'].shape[0]
    E = p['enc_g1'].shape[0]
    F2, F4 = 2 * F, 4 * F
    Ci = p['nl'][0]['gw'].shape[1]
    L = _layout(F, E, Ci)
    lane = L['lane']
    wo, co = L['w'], L['c']

    w_slab = np.zeros((L['w_rows'], lane), np.float32)

    def put_w(off, arr):
        arr = np.asarray(arr, np.float32)
        w_slab[off:off + arr.shape[0], 0:arr.shape[1]] = arr

    put_w(wo['enc_w1'], p['enc_w1'])
    put_w(wo['enc_w2'], p['enc_w2'])
    put_w(wo['enc_w3'], p['enc_w3'])
    put_w(wo['dec_w1'], p['dec_w1'])
    put_w(wo['dec_w2'], p['dec_w2'])

    # fold branch_fc1 / branch_fc2 / logits into a single (F,1) vector + scalar
    head_w = np.concatenate([np.asarray(p['cls_w']), np.asarray(p['geo_w'])], axis=1)  # (F,F)
    head_b = np.concatenate([np.asarray(p['cls_b']), np.asarray(p['geo_b'])])          # (F,)
    log_w = np.asarray(p['log_w'])                                                     # (F,1)
    w_fold = head_w @ log_w                                                            # (F,1)
    b_fold = float(head_b @ log_w[:, 0] + np.asarray(p['log_b'])[0])
    put_w(wo['w_fold'], w_fold)

    row_b = np.zeros((8, lane), np.float32)
    row_b[0, :F2] = np.asarray(p['enc_b1'])
    row_b[1, :F4] = np.asarray(p['enc_b2'])
    row_b[2, :F4] = np.asarray(p['enc_b3'])
    row_b[3, :F2] = np.asarray(p['dec_b1'])
    row_b[4, :F] = np.asarray(p['dec_b2'])
    row_b[5, 0] = b_fold

    col_p = np.zeros((L['c_rows'], 1), np.float32)

    def put_c(off, vec):
        vec = np.asarray(vec, np.float32).reshape(-1)
        col_p[off:off + vec.shape[0], 0] = vec

    put_c(co['enc_g1'], p['enc_g1']); put_c(co['enc_be1'], p['enc_be1'])
    put_c(co['enc_g2'], p['enc_g2']); put_c(co['enc_be2'], p['enc_be2'])
    put_c(co['dec_g1'], p['dec_g1']); put_c(co['dec_be1'], p['dec_be1'])

    for i, blk in enumerate(p['nl']):
        gw, gb = np.asarray(blk['gw']), np.asarray(blk['gb'])
        tw, tb = np.asarray(blk['tw']), np.asarray(blk['tb'])
        pw_, pb_ = np.asarray(blk['pw']), np.asarray(blk['pb'])
        wf, wfb = np.asarray(blk['wf']), np.asarray(blk['wfb'])
        wft, wfp = wf[:Ci, 0], wf[Ci:, 0]

        pw_off, zw_off = L['nl_w'][i]
        fused = np.zeros((Ci + 2, E), np.float32)
        fused[:Ci] = gw.T                     # g projection (Ci, E)
        fused[Ci] = tw @ wft                  # theta folded through W_f
        fused[Ci + 1] = pw_ @ wfp             # phi   folded through W_f
        w_slab[pw_off:pw_off + Ci + 2, 0:E] = fused
        w_slab[zw_off:zw_off + E, 0:Ci] = np.asarray(blk['zw']).T   # W_z^T (E, Ci)

        pb_off, zb_off, g_off, b_off = L['nl_c'][i]
        pbias = np.zeros((Ci + 2,), np.float32)
        pbias[:Ci] = gb
        pbias[Ci] = tb @ wft + wfb[0]         # W_f bias folded into theta term
        pbias[Ci + 1] = pb_ @ wfp
        put_c(pb_off, pbias)
        put_c(zb_off, blk['zb'])
        put_c(g_off, blk['bng'])
        put_c(b_off, blk['bnb'])

    j = lambda a: jnp.asarray(a, jnp.float32)
    return dict(w_slab=j(w_slab), row_b=j(row_b), col_p=j(col_p))


# ---------------------------------------------------------------------------
# Pure-JAX reference (unfolded/unfused math) — validates folding + packing
# ---------------------------------------------------------------------------
def reference_forward(x, p):
    E = x.shape[1]

    def bn(h, g, b, axes):
        m = jnp.mean(h, axis=axes, keepdims=True)
        v = jnp.mean(jnp.square(h - m), axis=axes, keepdims=True)
        return (h - m) / jnp.sqrt(v + EPS) * g + b

    h = jnp.maximum(bn(x @ p['enc_w1'] + p['enc_b1'],
                       p['enc_g1'].reshape(1, E, 1), p['enc_be1'].reshape(1, E, 1), (0, 2)), 0.0)
    h = jnp.maximum(bn(h @ p['enc_w2'] + p['enc_b2'],
                       p['enc_g2'].reshape(1, E, 1), p['enc_be2'].reshape(1, E, 1), (0, 2)), 0.0)
    h = jax.nn.sigmoid(h @ p['enc_w3'] + p['enc_b3'])                 # (B, E, T)

    def nl(xin, blk):
        T = xin.shape[2]
        Ci = blk['gw'].shape[1]
        x_cl = jnp.swapaxes(xin, 1, 2)                                # (B, T, E)
        g_x = x_cl @ blk['gw'] + blk['gb']                            # (B, T, Ci)
        th = x_cl @ blk['tw'] + blk['tb']
        ph = x_cl @ blk['pw'] + blk['pb']
        wft, wfp = blk['wf'][:Ci, 0], blk['wf'][Ci:, 0]
        f = jnp.maximum(th @ wft[:, None] + (ph @ wfp)[:, None, :] + blk['wfb'], 0.0)
        y = jnp.einsum('bij,bjc->bic', f / T, g_x)                    # (B, T, Ci)
        wy = y @ blk['zw'] + blk['zb']                                # (B, T, E)
        z = bn(wy, blk['bng'].reshape(1, 1, E), blk['bnb'].reshape(1, 1, E), (0, 1)) + x_cl
        return jnp.swapaxes(z, 1, 2)

    for blk in p['nl']:
        h = nl(h, blk)

    h1 = jnp.maximum(bn(h @ p['dec_w1'] + p['dec_b1'],
                        p['dec_g1'].reshape(1, E, 1), p['dec_be1'].reshape(1, E, 1), (0, 2)), 0.0)
    h2 = jnp.maximum(h1 @ p['dec_w2'] + p['dec_b2'], 0.0)
    syn_cls = h2 @ p['cls_w'] + p['cls_b']
    syn_geo = h2 @ p['geo_w'] + p['geo_b']
    res = jnp.concatenate([syn_cls, syn_geo], axis=-1)
    return jax.nn.sigmoid(res @ p['log_w'] + p['log_b'])


if __name__ == "__main__":
    FEATURE_SIZE, CLASS_NUM, ELEMENT_NUM, BATCH = 32, 4, 8, 2
    key = jax.random.PRNGKey(0)
    kx, kparams = jax.random.split(key)
    x = jax.random.normal(kx, (BATCH, ELEMENT_NUM, FEATURE_SIZE), jnp.float32)

    raw = init_raw_params(kparams, FEATURE_SIZE, CLASS_NUM, ELEMENT_NUM)
    packed = pack_params(raw)

    out = relation_discriminator_forward(x, packed)
    out = jax.block_until_ready(out)
    assert out.shape == (BATCH, ELEMENT_NUM, 1), out.shape

    ref = reference_forward(x, raw)
    np.testing.assert_allclose(np.asarray(out), np.asarray(ref), rtol=5e-2, atol=2e-2)

    print("KERNEL_OK")
</pallas_src>

<mosaic_0001>
module attributes {stable_mosaic.version = 11 : i64} {
  func.func @_relation_disc_kernel(%arg0: memref<2x8x32xf32, #tpu.memory_space<vmem>>, %arg1: memref<512x128xf32, #tpu.memory_space<vmem>>, %arg2: memref<8x128xf32, #tpu.memory_space<vmem>>, %arg3: memref<176x1xf32, #tpu.memory_space<vmem>>, %arg4: memref<16x1xf32, #tpu.memory_space<vmem>>) attributes {dimension_semantics = [], scalar_prefetch = 0 : i64, scratch_operands = 0 : i64, tpu.core_type = #tpu.core_type<tc>} {
    %c0 = arith.constant 0 : index
    %c0_0 = arith.constant 0 : index
    %0 = vector.load %arg2[%c0, %c0_0] : memref<8x128xf32, #tpu.memory_space<vmem>>, vector<8x128xf32>
    %c0_1 = arith.constant 0 : index
    %c0_2 = arith.constant 0 : index
    %1 = vector.load %arg3[%c0_1, %c0_2] : memref<176x1xf32, #tpu.memory_space<vmem>>, vector<176x1xf32>
    %c0_3 = arith.constant 0 : index
    %c0_4 = arith.constant 0 : index
    %c0_5 = arith.constant 0 : index
    %2 = vector.load %arg0[%c0_3, %c0_4, %c0_5] : memref<2x8x32xf32, #tpu.memory_space<vmem>>, vector<2x8x32xf32>
    %3 = vector.shape_cast %2 : vector<2x8x32xf32> to vector<16x32xf32>
    %c0_6 = arith.constant 0 : index
    %c0_7 = arith.constant 0 : index
    %4 = vector.load %arg1[%c0_6, %c0_7] : memref<512x128xf32, #tpu.memory_space<vmem>>, vector<32x64xf32>
    %cst = arith.constant dense<0.000000e+00> : vector<16x64xf32>
    %5 = tpu.matmul %3, %4, %cst {dimension_numbers = #tpu.dot_dimension_numbers<[1], [0], [0], [1], [0, 0, 1, 1], [], []>} : vector<16x32xf32>, vector<32x64xf32>, vector<16x64xf32> -> vector<16x64xf32>
    %6 = vector.extract_strided_slice %0 {offsets = [0, 0], sizes = [1, 64], strides = [1, 1]} : vector<8x128xf32> to vector<1x64xf32>
    %7 = vector.broadcast %6 : vector<1x64xf32> to vector<16x64xf32>
    %8 = arith.addf %5, %7 : vector<16x64xf32>
    %9 = vector.shape_cast %8 : vector<16x64xf32> to vector<2x8x64xf32>
    %cst_8 = arith.constant dense<0.000000e+00> : vector<8xf32>
    %10 = vector.multi_reduction <add>, %9, %cst_8 [0, 2] : vector<2x8x64xf32> to vector<8xf32>
    %11 = vector.shape_cast %10 : vector<8xf32> to vector<1x8x1xf32>
    %cst_9 = arith.constant 1.280000e+02 : f32
    %12 = vector.broadcast %cst_9 : f32 to vector<1x8x1xf32>
    %13 = arith.divf %11, %12 : vector<1x8x1xf32>
    %14 = arith.mulf %9, %9 : vector<2x8x64xf32>
    %cst_10 = arith.constant dense<0.000000e+00> : vector<8xf32>
    %15 = vector.multi_reduction <add>, %14, %cst_10 [0, 2] : vector<2x8x64xf32> to vector<8xf32>
    %16 = vector.shape_cast %15 : vector<8xf32> to vector<1x8x1xf32>
    %cst_11 = arith.constant 1.280000e+02 : f32
    %17 = vector.broadcast %cst_11 : f32 to vector<1x8x1xf32>
    %18 = arith.divf %16, %17 : vector<1x8x1xf32>
    %19 = arith.mulf %13, %13 : vector<1x8x1xf32>
    %20 = arith.subf %18, %19 : vector<1x8x1xf32>
    %cst_12 = arith.constant 9.99999974E-6 : f32
    %21 = vector.broadcast %cst_12 : f32 to vector<1x8x1xf32>
    %22 = arith.addf %20, %21 : vector<1x8x1xf32>
    %23 = math.rsqrt %22 : vector<1x8x1xf32>
    %24 = vector.extract_strided_slice %1 {offsets = [0, 0], sizes = [8, 1], strides = [1, 1]} : vector<176x1xf32> to vector<8x1xf32>
    %25 = vector.shape_cast %24 : vector<8x1xf32> to vector<1x8x1xf32>
    %26 = vector.extract_strided_slice %1 {offsets = [8, 0], sizes = [8, 1], strides = [1, 1]} : vector<176x1xf32> to vector<8x1xf32>
    %27 = vector.shape_cast %26 : vector<8x1xf32> to vector<1x8x1xf32>
    %28 = vector.broadcast %13 : vector<1x8x1xf32> to vector<2x8x64xf32>
    %29 = arith.subf %9, %28 : vector<2x8x64xf32>
    %30 = vector.broadcast %23 : vector<1x8x1xf32> to vector<2x8x64xf32>
    %31 = arith.mulf %29, %30 : vector<2x8x64xf32>
    %32 = vector.broadcast %25 : vector<1x8x1xf32> to vector<2x8x64xf32>
    %33 = arith.mulf %31, %32 : vector<2x8x64xf32>
    %34 = vector.broadcast %27 : vector<1x8x1xf32> to vector<2x8x64xf32>
    %35 = arith.addf %33, %34 : vector<2x8x64xf32>
    %36 = vector.shape_cast %35 : vector<2x8x64xf32> to vector<16x64xf32>
    %cst_13 = arith.constant 0.000000e+00 : f32
    %37 = vector.broadcast %cst_13 : f32 to vector<16x64xf32>
    %38 = arith.maximumf %36, %37 : vector<16x64xf32>
    %c32 = arith.constant 32 : index
    %c0_14 = arith.constant 0 : index
    %39 = vector.load %arg1[%c32, %c0_14] : memref<512x128xf32, #tpu.memory_space<vmem>>, vector<64x128xf32>
    %cst_15 = arith.constant dense<0.000000e+00> : vector<16x128xf32>
    %40 = tpu.matmul %38, %39, %cst_15 {dimension_numbers = #tpu.dot_dimension_numbers<[1], [0], [0], [1], [0, 0, 1, 1], [], []>} : vector<16x64xf32>, vector<64x128xf32>, vector<16x128xf32> -> vector<16x128xf32>
    %41 = vector.extract_strided_slice %0 {offsets = [1, 0], sizes = [1, 128], strides = [1, 1]} : vector<8x128xf32> to vector<1x128xf32>
    %42 = vector.broadcast %41 : vector<1x128xf32> to vector<16x128xf32>
    %43 = arith.addf %40, %42 : vector<16x128xf32>
    %44 = vector.shape_cast %43 : vector<16x128xf32> to vector<2x8x128xf32>
    %cst_16 = arith.constant dense<0.000000e+00> : vector<8xf32>
    %45 = vector.multi_reduction <add>, %44, %cst_16 [0, 2] : vector<2x8x128xf32> to vector<8xf32>
    %46 = vector.shape_cast %45 : vector<8xf32> to vector<1x8x1xf32>
    %cst_17 = arith.constant 2.560000e+02 : f32
    %47 = vector.broadcast %cst_17 : f32 to vector<1x8x1xf32>
    %48 = arith.divf %46, %47 : vector<1x8x1xf32>
    %49 = arith.mulf %44, %44 : vector<2x8x128xf32>
    %cst_18 = arith.constant dense<0.000000e+00> : vector<8xf32>
    %50 = vector.multi_reduction <add>, %49, %cst_18 [0, 2] : vector<2x8x128xf32> to vector<8xf32>
    %51 = vector.shape_cast %50 : vector<8xf32> to vector<1x8x1xf32>
    %cst_19 = arith.constant 2.560000e+02 : f32
    %52 = vector.broadcast %cst_19 : f32 to vector<1x8x1xf32>
    %53 = arith.divf %51, %52 : vector<1x8x1xf32>
    %54 = arith.mulf %48, %48 : vector<1x8x1xf32>
    %55 = arith.subf %53, %54 : vector<1x8x1xf32>
    %cst_20 = arith.constant 9.99999974E-6 : f32
    %56 = vector.broadcast %cst_20 : f32 to vector<1x8x1xf32>
    %57 = arith.addf %55, %56 : vector<1x8x1xf32>
    %58 = math.rsqrt %57 : vector<1x8x1xf32>
    %59 = vector.extract_strided_slice %1 {offsets = [16, 0], sizes = [8, 1], strides = [1, 1]} : vector<176x1xf32> to vector<8x1xf32>
    %60 = vector.shape_cast %59 : vector<8x1xf32> to vector<1x8x1xf32>
    %61 = vector.extract_strided_slice %1 {offsets = [24, 0], sizes = [8, 1], strides = [1, 1]} : vector<176x1xf32> to vector<8x1xf32>
    %62 = vector.shape_cast %61 : vector<8x1xf32> to vector<1x8x1xf32>
    %63 = vector.broadcast %48 : vector<1x8x1xf32> to vector<2x8x128xf32>
    %64 = arith.subf %44, %63 : vector<2x8x128xf32>
    %65 = vector.broadcast %58 : vector<1x8x1xf32> to vector<2x8x128xf32>
    %66 = arith.mulf %64, %65 : vector<2x8x128xf32>
    %67 = vector.broadcast %60 : vector<1x8x1xf32> to vector<2x8x128xf32>
    %68 = arith.mulf %66, %67 : vector<2x8x128xf32>
    %69 = vector.broadcast %62 : vector<1x8x1xf32> to vector<2x8x128xf32>
    %70 = arith.addf %68, %69 : vector<2x8x128xf32>
    %71 = vector.shape_cast %70 : vector<2x8x128xf32> to vector<16x128xf32>
    %cst_21 = arith.constant 0.000000e+00 : f32
    %72 = vector.broadcast %cst_21 : f32 to vector<16x128xf32>
    %73 = arith.maximumf %71, %72 : vector<16x128xf32>
    %c96 = arith.constant 96 : index
    %c0_22 = arith.constant 0 : index
    %74 = vector.load %arg1[%c96, %c0_22] : memref<512x128xf32, #tpu.memory_space<vmem>>, vector<128x128xf32>
    %cst_23 = arith.constant dense<0.000000e+00> : vector<16x128xf32>
    %75 = tpu.matmul %73, %74, %cst_23 {dimension_numbers = #tpu.dot_dimension_numbers<[1], [0], [0], [1], [0, 0, 1, 1], [], []>} : vector<16x128xf32>, vector<128x128xf32>, vector<16x128xf32> -> vector<16x128xf32>
    %76 = vector.extract_strided_slice %0 {offsets = [2, 0], sizes = [1, 128], strides = [1, 1]} : vector<8x128xf32> to vector<1x128xf32>
    %77 = vector.broadcast %76 : vector<1x128xf32> to vector<16x128xf32>
    %78 = arith.addf %75, %77 : vector<16x128xf32>
    %79 = arith.negf %78 : vector<16x128xf32>
    %80 = math.exp %79 : vector<16x128xf32>
    %cst_24 = arith.constant 1.000000e+00 : f32
    %81 = vector.broadcast %cst_24 : f32 to vector<16x128xf32>
    %82 = arith.addf %81, %80 : vector<16x128xf32>
    %83 = arith.divf %81, %82 : vector<16x128xf32>
    %84 = vector.extract_strided_slice %83 {offsets = [0, 0], sizes = [8, 128], strides = [1, 1]} : vector<16x128xf32> to vector<8x128xf32>
    %85 = vector.extract_strided_slice %83 {offsets = [8, 0], sizes = [8, 128], strides = [1, 1]} : vector<16x128xf32> to vector<8x128xf32>
    %86 = tpu.concatenate %84, %85 in 1 : vector<8x128xf32>, vector<8x128xf32> -> vector<8x256xf32>
    %c448 = arith.constant 448 : index
    %c0_25 = arith.constant 0 : index
    %87 = vector.load %arg1[%c448, %c0_25] : memref<512x128xf32, #tpu.memory_space<vmem>>, vector<6x8xf32>
    %c456 = arith.constant 456 : index
    %c0_26 = arith.constant 0 : index
    %88 = vector.load %arg1[%c456, %c0_26] : memref<512x128xf32, #tpu.memory_space<vmem>>, vector<8x4xf32>
    %89 = vector.extract_strided_slice %1 {offsets = [48, 0], sizes = [6, 1], strides = [1, 1]} : vector<176x1xf32> to vector<6x1xf32>
    %90 = vector.extract_strided_slice %1 {offsets = [56, 0], sizes = [8, 1], strides = [1, 1]} : vector<176x1xf32> to vector<8x1xf32>
    %91 = vector.extract_strided_slice %1 {offsets = [64, 0], sizes = [8, 1], strides = [1, 1]} : vector<176x1xf32> to vector<8x1xf32>
    %92 = vector.extract_strided_slice %1 {offsets = [72, 0], sizes = [8, 1], strides = [1, 1]} : vector<176x1xf32> to vector<8x1xf32>
    %cst_27 = arith.constant dense<0.000000e+00> : vector<6x256xf32>
    %93 = tpu.matmul %87, %86, %cst_27 {dimension_numbers = #tpu.dot_dimension_numbers<[1], [0], [0], [1], [0, 0, 1, 1], [], []>} : vector<6x8xf32>, vector<8x256xf32>, vector<6x256xf32> -> vector<6x256xf32>
    %94 = vector.broadcast %89 : vector<6x1xf32> to vector<6x256xf32>
    %95 = arith.addf %93, %94 : vector<6x256xf32>
    %96 = vector.extract_strided_slice %95 {offsets = [0, 0], sizes = [4, 256], strides = [1, 1]} : vector<6x256xf32> to vector<4x256xf32>
    %97 = vector.extract_strided_slice %95 {offsets = [4, 0], sizes = [1, 256], strides = [1, 1]} : vector<6x256xf32> to vector<1x256xf32>
    %98 = vector.extract_strided_slice %95 {offsets = [5, 0], sizes = [1, 256], strides = [1, 1]} : vector<6x256xf32> to vector<1x256xf32>
    %99 = tpu.transpose %98, [1, 0] : vector<1x256xf32> -> vector<256x1xf32>
    %100 = vector.extract_strided_slice %99 {offsets = [0, 0], sizes = [128, 1], strides = [1, 1]} : vector<256x1xf32> to vector<128x1xf32>
    %101 = vector.extract_strided_slice %97 {offsets = [0, 0], sizes = [1, 128], strides = [1, 1]} : vector<1x256xf32> to vector<1x128xf32>
    %102 = vector.broadcast %100 : vector<128x1xf32> to vector<128x128xf32>
    %103 = vector.broadcast %101 : vector<1x128xf32> to vector<128x128xf32>
    %104 = arith.addf %102, %103 : vector<128x128xf32>
    %cst_28 = arith.constant 0.000000e+00 : f32
    %105 = vector.broadcast %cst_28 : f32 to vector<128x128xf32>
    %106 = arith.maximumf %104, %105 : vector<128x128xf32>
    %107 = vector.extract_strided_slice %96 {offsets = [0, 0], sizes = [4, 128], strides = [1, 1]} : vector<4x256xf32> to vector<4x128xf32>
    %cst_29 = arith.constant dense<0.000000e+00> : vector<4x128xf32>
    %108 = tpu.matmul %107, %106, %cst_29 {dimension_numbers = #tpu.dot_dimension_numbers<[1], [0], [0], [1], [0, 0, 1, 1], [], []>} : vector<4x128xf32>, vector<128x128xf32>, vector<4x128xf32> -> vector<4x128xf32>
    %109 = vector.extract_strided_slice %99 {offsets = [128, 0], sizes = [128, 1], strides = [1, 1]} : vector<256x1xf32> to vector<128x1xf32>
    %110 = vector.extract_strided_slice %97 {offsets = [0, 128], sizes = [1, 128], strides = [1, 1]} : vector<1x256xf32> to vector<1x128xf32>
    %111 = vector.broadcast %109 : vector<128x1xf32> to vector<128x128xf32>
    %112 = vector.broadcast %110 : vector<1x128xf32> to vector<128x128xf32>
    %113 = arith.addf %111, %112 : vector<128x128xf32>
    %cst_30 = arith.constant 0.000000e+00 : f32
    %114 = vector.broadcast %cst_30 : f32 to vector<128x128xf32>
    %115 = arith.maximumf %113, %114 : vector<128x128xf32>
    %116 = vector.extract_strided_slice %96 {offsets = [0, 128], sizes = [4, 128], strides = [1, 1]} : vector<4x256xf32> to vector<4x128xf32>
    %cst_31 = arith.constant dense<0.000000e+00> : vector<4x128xf32>
    %117 = tpu.matmul %116, %115, %cst_31 {dimension_numbers = #tpu.dot_dimension_numbers<[1], [0], [0], [1], [0, 0, 1, 1], [], []>} : vector<4x128xf32>, vector<128x128xf32>, vector<4x128xf32> -> vector<4x128xf32>
    %118 = tpu.concatenate %108, %117 in 1 : vector<4x128xf32>, vector<4x128xf32> -> vector<4x256xf32>
    %cst_32 = arith.constant 7.812500e-03 : f32
    %119 = vector.broadcast %cst_32 : f32 to vector<4x256xf32>
    %120 = arith.mulf %118, %119 : vector<4x256xf32>
    %cst_33 = arith.constant dense<0.000000e+00> : vector<8x256xf32>
    %121 = tpu.matmul %88, %120, %cst_33 {dimension_numbers = #tpu.dot_dimension_numbers<[1], [0], [0], [1], [0, 0, 1, 1], [], []>} : vector<8x4xf32>, vector<4x256xf32>, vector<8x256xf32> -> vector<8x256xf32>
    %122 = vector.broadcast %90 : vector<8x1xf32> to vector<8x256xf32>
    %123 = arith.addf %121, %122 : vector<8x256xf32>
    %cst_34 = arith.constant dense<0.000000e+00> : vector<8xf32>
    %124 = vector.multi_reduction <add>, %123, %cst_34 [1] : vector<8x256xf32> to vector<8xf32>
    %125 = vector.shape_cast %124 : vector<8xf32> to vector<8x1xf32>
    %cst_35 = arith.constant 2.560000e+02 : f32
    %126 = vector.broadcast %cst_35 : f32 to vector<8x1xf32>
    %127 = arith.divf %125, %126 : vector<8x1xf32>
    %128 = arith.mulf %123, %123 : vector<8x256xf32>
    %cst_36 = arith.constant dense<0.000000e+00> : vector<8xf32>
    %129 = vector.multi_reduction <add>, %128, %cst_36 [1] : vector<8x256xf32> to vector<8xf32>
    %130 = vector.shape_cast %129 : vector<8xf32> to vector<8x1xf32>
    %cst_37 = arith.constant 2.560000e+02 : f32
    %131 = vector.broadcast %cst_37 : f32 to vector<8x1xf32>
    %132 = arith.divf %130, %131 : vector<8x1xf32>
    %133 = arith.mulf %127, %127 : vector<8x1xf32>
    %134 = arith.subf %132, %133 : vector<8x1xf32>
    %cst_38 = arith.constant 9.99999974E-6 : f32
    %135 = vector.broadcast %cst_38 : f32 to vector<8x1xf32>
    %136 = arith.addf %134, %135 : vector<8x1xf32>
    %137 = math.rsqrt %136 : vector<8x1xf32>
    %138 = vector.broadcast %127 : vector<8x1xf32> to vector<8x256xf32>
    %139 = arith.subf %123, %138 : vector<8x256xf32>
    %140 = vector.broadcast %137 : vector<8x1xf32> to vector<8x256xf32>
    %141 = arith.mulf %139, %140 : vector<8x256xf32>
    %142 = vector.broadcast %91 : vector<8x1xf32> to vector<8x256xf32>
    %143 = arith.mulf %141, %142 : vector<8x256xf32>
    %144 = vector.broadcast %92 : vector<8x1xf32> to vector<8x256xf32>
    %145 = arith.addf %143, %144 : vector<8x256xf32>
    %146 = arith.addf %145, %86 : vector<8x256xf32>
    %c464 = arith.constant 464 : index
    %c0_39 = arith.constant 0 : index
    %147 = vector.load %arg1[%c464, %c0_39] : memref<512x128xf32, #tpu.memory_space<vmem>>, vector<6x8xf32>
    %c472 = arith.constant 472 : index
    %c0_40 = arith.constant 0 : index
    %148 = vector.load %arg1[%c472, %c0_40] : memref<512x128xf32, #tpu.memory_space<vmem>>, vector<8x4xf32>
    %149 = vector.extract_strided_slice %1 {offsets = [80, 0], sizes = [6, 1], strides = [1, 1]} : vector<176x1xf32> to vector<6x1xf32>
    %150 = vector.extract_strided_slice %1 {offsets = [88, 0], sizes = [8, 1], strides = [1, 1]} : vector<176x1xf32> to vector<8x1xf32>
    %151 = vector.extract_strided_slice %1 {offsets = [96, 0], sizes = [8, 1], strides = [1, 1]} : vector<176x1xf32> to vector<8x1xf32>
    %152 = vector.extract_strided_slice %1 {offsets = [104, 0], sizes = [8, 1], strides = [1, 1]} : vector<176x1xf32> to vector<8x1xf32>
    %cst_41 = arith.constant dense<0.000000e+00> : vector<6x256xf32>
    %153 = tpu.matmul %147, %146, %cst_41 {dimension_numbers = #tpu.dot_dimension_numbers<[1], [0], [0], [1], [0, 0, 1, 1], [], []>} : vector<6x8xf32>, vector<8x256xf32>, vector<6x256xf32> -> vector<6x256xf32>
    %154 = vector.broadcast %149 : vector<6x1xf32> to vector<6x256xf32>
    %155 = arith.addf %153, %154 : vector<6x256xf32>
    %156 = vector.extract_strided_slice %155 {offsets = [0, 0], sizes = [4, 256], strides = [1, 1]} : vector<6x256xf32> to vector<4x256xf32>
    %157 = vector.extract_strided_slice %155 {offsets = [4, 0], sizes = [1, 256], strides = [1, 1]} : vector<6x256xf32> to vector<1x256xf32>
    %158 = vector.extract_strided_slice %155 {offsets = [5, 0], sizes = [1, 256], strides = [1, 1]} : vector<6x256xf32> to vector<1x256xf32>
    %159 = tpu.transpose %158, [1, 0] : vector<1x256xf32> -> vector<256x1xf32>
    %160 = vector.extract_strided_slice %159 {offsets = [0, 0], sizes = [128, 1], strides = [1, 1]} : vector<256x1xf32> to vector<128x1xf32>
    %161 = vector.extract_strided_slice %157 {offsets = [0, 0], sizes = [1, 128], strides = [1, 1]} : vector<1x256xf32> to vector<1x128xf32>
    %162 = vector.broadcast %160 : vector<128x1xf32> to vector<128x128xf32>
    %163 = vector.broadcast %161 : vector<1x128xf32> to vector<128x128xf32>
    %164 = arith.addf %162, %163 : vector<128x128xf32>
    %cst_42 = arith.constant 0.000000e+00 : f32
    %165 = vector.broadcast %cst_42 : f32 to vector<128x128xf32>
    %166 = arith.maximumf %164, %165 : vector<128x128xf32>
    %167 = vector.extract_strided_slice %156 {offsets = [0, 0], sizes = [4, 128], strides = [1, 1]} : vector<4x256xf32> to vector<4x128xf32>
    %cst_43 = arith.constant dense<0.000000e+00> : vector<4x128xf32>
    %168 = tpu.matmul %167, %166, %cst_43 {dimension_numbers = #tpu.dot_dimension_numbers<[1], [0], [0], [1], [0, 0, 1, 1], [], []>} : vector<4x128xf32>, vector<128x128xf32>, vector<4x128xf32> -> vector<4x128xf32>
    %169 = vector.extract_strided_slice %159 {offsets = [128, 0], sizes = [128, 1], strides = [1, 1]} : vector<256x1xf32> to vector<128x1xf32>
    %170 = vector.extract_strided_slice %157 {offsets = [0, 128], sizes = [1, 128], strides = [1, 1]} : vector<1x256xf32> to vector<1x128xf32>
    %171 = vector.broadcast %169 : vector<128x1xf32> to vector<128x128xf32>
    %172 = vector.broadcast %170 : vector<1x128xf32> to vector<128x128xf32>
    %173 = arith.addf %171, %172 : vector<128x128xf32>
    %cst_44 = arith.constant 0.000000e+00 : f32
    %174 = vector.broadcast %cst_44 : f32 to vector<128x128xf32>
    %175 = arith.maximumf %173, %174 : vector<128x128xf32>
    %176 = vector.extract_strided_slice %156 {offsets = [0, 128], sizes = [4, 128], strides = [1, 1]} : vector<4x256xf32> to vector<4x128xf32>
    %cst_45 = arith.constant dense<0.000000e+00> : vector<4x128xf32>
    %177 = tpu.matmul %176, %175, %cst_45 {dimension_numbers = #tpu.dot_dimension_numbers<[1], [0], [0], [1], [0, 0, 1, 1], [], []>} : vector<4x128xf32>, vector<128x128xf32>, vector<4x128xf32> -> vector<4x128xf32>
    %178 = tpu.concatenate %168, %177 in 1 : vector<4x128xf32>, vector<4x128xf32> -> vector<4x256xf32>
    %cst_46 = arith.constant 7.812500e-03 : f32
    %179 = vector.broadcast %cst_46 : f32 to vector<4x256xf32>
    %180 = arith.mulf %178, %179 : vector<4x256xf32>
    %cst_47 = arith.constant dense<0.000000e+00> : vector<8x256xf32>
    %181 = tpu.matmul %148, %180, %cst_47 {dimension_numbers = #tpu.dot_dimension_numbers<[1], [0], [0], [1], [0, 0, 1, 1], [], []>} : vector<8x4xf32>, vector<4x256xf32>, vector<8x256xf32> -> vector<8x256xf32>
    %182 = vector.broadcast %150 : vector<8x1xf32> to vector<8x256xf32>
    %183 = arith.addf %181, %182 : vector<8x256xf32>
    %cst_48 = arith.constant dense<0.000000e+00> : vector<8xf32>
    %184 = vector.multi_reduction <add>, %183, %cst_48 [1] : vector<8x256xf32> to vector<8xf32>
    %185 = vector.shape_cast %184 : vector<8xf32> to vector<8x1xf32>
    %cst_49 = arith.constant 2.560000e+02 : f32
    %186 = vector.broadcast %cst_49 : f32 to vector<8x1xf32>
    %187 = arith.divf %185, %186 : vector<8x1xf32>
    %188 = arith.mulf %183, %183 : vector<8x256xf32>
    %cst_50 = arith.constant dense<0.000000e+00> : vector<8xf32>
    %189 = vector.multi_reduction <add>, %188, %cst_50 [1] : vector<8x256xf32> to vector<8xf32>
    %190 = vector.shape_cast %189 : vector<8xf32> to vector<8x1xf32>
    %cst_51 = arith.constant 2.560000e+02 : f32
    %191 = vector.broadcast %cst_51 : f32 to vector<8x1xf32>
    %192 = arith.divf %190, %191 : vector<8x1xf32>
    %193 = arith.mulf %187, %187 : vector<8x1xf32>
    %194 = arith.subf %192, %193 : vector<8x1xf32>
    %cst_52 = arith.constant 9.99999974E-6 : f32
    %195 = vector.broadcast %cst_52 : f32 to vector<8x1xf32>
    %196 = arith.addf %194, %195 : vector<8x1xf32>
    %197 = math.rsqrt %196 : vector<8x1xf32>
    %198 = vector.broadcast %187 : vector<8x1xf32> to vector<8x256xf32>
    %199 = arith.subf %183, %198 : vector<8x256xf32>
    %200 = vector.broadcast %197 : vector<8x1xf32> to vector<8x256xf32>
    %201 = arith.mulf %199, %200 : vector<8x256xf32>
    %202 = vector.broadcast %151 : vector<8x1xf32> to vector<8x256xf32>
    %203 = arith.mulf %201, %202 : vector<8x256xf32>
    %204 = vector.broadcast %152 : vector<8x1xf32> to vector<8x256xf32>
    %205 = arith.addf %203, %204 : vector<8x256xf32>
    %206 = arith.addf %205, %146 : vector<8x256xf32>
    %c480 = arith.constant 480 : index
    %c0_53 = arith.constant 0 : index
    %207 = vector.load %arg1[%c480, %c0_53] : memref<512x128xf32, #tpu.memory_space<vmem>>, vector<6x8xf32>
    %c488 = arith.constant 488 : index
    %c0_54 = arith.constant 0 : index
    %208 = vector.load %arg1[%c488, %c0_54] : memref<512x128xf32, #tpu.memory_space<vmem>>, vector<8x4xf32>
    %209 = vector.extract_strided_slice %1 {offsets = [112, 0], sizes = [6, 1], strides = [1, 1]} : vector<176x1xf32> to vector<6x1xf32>
    %210 = vector.extract_strided_slice %1 {offsets = [120, 0], sizes = [8, 1], strides = [1, 1]} : vector<176x1xf32> to vector<8x1xf32>
    %211 = vector.extract_strided_slice %1 {offsets = [128, 0], sizes = [8, 1], strides = [1, 1]} : vector<176x1xf32> to vector<8x1xf32>
    %212 = vector.extract_strided_slice %1 {offsets = [136, 0], sizes = [8, 1], strides = [1, 1]} : vector<176x1xf32> to vector<8x1xf32>
    %cst_55 = arith.constant dense<0.000000e+00> : vector<6x256xf32>
    %213 = tpu.matmul %207, %206, %cst_55 {dimension_numbers = #tpu.dot_dimension_numbers<[1], [0], [0], [1], [0, 0, 1, 1], [], []>} : vector<6x8xf32>, vector<8x256xf32>, vector<6x256xf32> -> vector<6x256xf32>
    %214 = vector.broadcast %209 : vector<6x1xf32> to vector<6x256xf32>
    %215 = arith.addf %213, %214 : vector<6x256xf32>
    %216 = vector.extract_strided_slice %215 {offsets = [0, 0], sizes = [4, 256], strides = [1, 1]} : vector<6x256xf32> to vector<4x256xf32>
    %217 = vector.extract_strided_slice %215 {offsets = [4, 0], sizes = [1, 256], strides = [1, 1]} : vector<6x256xf32> to vector<1x256xf32>
    %218 = vector.extract_strided_slice %215 {offsets = [5, 0], sizes = [1, 256], strides = [1, 1]} : vector<6x256xf32> to vector<1x256xf32>
    %219 = tpu.transpose %218, [1, 0] : vector<1x256xf32> -> vector<256x1xf32>
    %220 = vector.extract_strided_slice %219 {offsets = [0, 0], sizes = [128, 1], strides = [1, 1]} : vector<256x1xf32> to vector<128x1xf32>
    %221 = vector.extract_strided_slice %217 {offsets = [0, 0], sizes = [1, 128], strides = [1, 1]} : vector<1x256xf32> to vector<1x128xf32>
    %222 = vector.broadcast %220 : vector<128x1xf32> to vector<128x128xf32>
    %223 = vector.broadcast %221 : vector<1x128xf32> to vector<128x128xf32>
    %224 = arith.addf %222, %223 : vector<128x128xf32>
    %cst_56 = arith.constant 0.000000e+00 : f32
    %225 = vector.broadcast %cst_56 : f32 to vector<128x128xf32>
    %226 = arith.maximumf %224, %225 : vector<128x128xf32>
    %227 = vector.extract_strided_slice %216 {offsets = [0, 0], sizes = [4, 128], strides = [1, 1]} : vector<4x256xf32> to vector<4x128xf32>
    %cst_57 = arith.constant dense<0.000000e+00> : vector<4x128xf32>
    %228 = tpu.matmul %227, %226, %cst_57 {dimension_numbers = #tpu.dot_dimension_numbers<[1], [0], [0], [1], [0, 0, 1, 1], [], []>} : vector<4x128xf32>, vector<128x128xf32>, vector<4x128xf32> -> vector<4x128xf32>
    %229 = vector.extract_strided_slice %219 {offsets = [128, 0], sizes = [128, 1], strides = [1, 1]} : vector<256x1xf32> to vector<128x1xf32>
    %230 = vector.extract_strided_slice %217 {offsets = [0, 128], sizes = [1, 128], strides = [1, 1]} : vector<1x256xf32> to vector<1x128xf32>
    %231 = vector.broadcast %229 : vector<128x1xf32> to vector<128x128xf32>
    %232 = vector.broadcast %230 : vector<1x128xf32> to vector<128x128xf32>
    %233 = arith.addf %231, %232 : vector<128x128xf32>
    %cst_58 = arith.constant 0.000000e+00 : f32
    %234 = vector.broadcast %cst_58 : f32 to vector<128x128xf32>
    %235 = arith.maximumf %233, %234 : vector<128x128xf32>
    %236 = vector.extract_strided_slice %216 {offsets = [0, 128], sizes = [4, 128], strides = [1, 1]} : vector<4x256xf32> to vector<4x128xf32>
    %cst_59 = arith.constant dense<0.000000e+00> : vector<4x128xf32>
    %237 = tpu.matmul %236, %235, %cst_59 {dimension_numbers = #tpu.dot_dimension_numbers<[1], [0], [0], [1], [0, 0, 1, 1], [], []>} : vector<4x128xf32>, vector<128x128xf32>, vector<4x128xf32> -> vector<4x128xf32>
    %238 = tpu.concatenate %228, %237 in 1 : vector<4x128xf32>, vector<4x128xf32> -> vector<4x256xf32>
    %cst_60 = arith.constant 7.812500e-03 : f32
    %239 = vector.broadcast %cst_60 : f32 to vector<4x256xf32>
    %240 = arith.mulf %238, %239 : vector<4x256xf32>
    %cst_61 = arith.constant dense<0.000000e+00> : vector<8x256xf32>
    %241 = tpu.matmul %208, %240, %cst_61 {dimension_numbers = #tpu.dot_dimension_numbers<[1], [0], [0], [1], [0, 0, 1, 1], [], []>} : vector<8x4xf32>, vector<4x256xf32>, vector<8x256xf32> -> vector<8x256xf32>
    %242 = vector.broadcast %210 : vector<8x1xf32> to vector<8x256xf32>
    %243 = arith.addf %241, %242 : vector<8x256xf32>
    %cst_62 = arith.constant dense<0.000000e+00> : vector<8xf32>
    %244 = vector.multi_reduction <add>, %243, %cst_62 [1] : vector<8x256xf32> to vector<8xf32>
    %245 = vector.shape_cast %244 : vector<8xf32> to vector<8x1xf32>
    %cst_63 = arith.constant 2.560000e+02 : f32
    %246 = vector.broadcast %cst_63 : f32 to vector<8x1xf32>
    %247 = arith.divf %245, %246 : vector<8x1xf32>
    %248 = arith.mulf %243, %243 : vector<8x256xf32>
    %cst_64 = arith.constant dense<0.000000e+00> : vector<8xf32>
    %249 = vector.multi_reduction <add>, %248, %cst_64 [1] : vector<8x256xf32> to vector<8xf32>
    %250 = vector.shape_cast %249 : vector<8xf32> to vector<8x1xf32>
    %cst_65 = arith.constant 2.560000e+02 : f32
    %251 = vector.broadcast %cst_65 : f32 to vector<8x1xf32>
    %252 = arith.divf %250, %251 : vector<8x1xf32>
    %253 = arith.mulf %247, %247 : vector<8x1xf32>
    %254 = arith.subf %252, %253 : vector<8x1xf32>
    %cst_66 = arith.constant 9.99999974E-6 : f32
    %255 = vector.broadcast %cst_66 : f32 to vector<8x1xf32>
    %256 = arith.addf %254, %255 : vector<8x1xf32>
    %257 = math.rsqrt %256 : vector<8x1xf32>
    %258 = vector.broadcast %247 : vector<8x1xf32> to vector<8x256xf32>
    %259 = arith.subf %243, %258 : vector<8x256xf32>
    %260 = vector.broadcast %257 : vector<8x1xf32> to vector<8x256xf32>
    %261 = arith.mulf %259, %260 : vector<8x256xf32>
    %262 = vector.broadcast %211 : vector<8x1xf32> to vector<8x256xf32>
    %263 = arith.mulf %261, %262 : vector<8x256xf32>
    %264 = vector.broadcast %212 : vector<8x1xf32> to vector<8x256xf32>
    %265 = arith.addf %263, %264 : vector<8x256xf32>
    %266 = arith.addf %265, %206 : vector<8x256xf32>
    %c496 = arith.constant 496 : index
    %c0_67 = arith.constant 0 : index
    %267 = vector.load %arg1[%c496, %c0_67] : memref<512x128xf32, #tpu.memory_space<vmem>>, vector<6x8xf32>
    %c504 = arith.constant 504 : index
    %c0_68 = arith.constant 0 : index
    %268 = vector.load %arg1[%c504, %c0_68] : memref<512x128xf32, #tpu.memory_space<vmem>>, vector<8x4xf32>
    %269 = vector.extract_strided_slice %1 {offsets = [144, 0], sizes = [6, 1], strides = [1, 1]} : vector<176x1xf32> to vector<6x1xf32>
    %270 = vector.extract_strided_slice %1 {offsets = [152, 0], sizes = [8, 1], strides = [1, 1]} : vector<176x1xf32> to vector<8x1xf32>
    %271 = vector.extract_strided_slice %1 {offsets = [160, 0], sizes = [8, 1], strides = [1, 1]} : vector<176x1xf32> to vector<8x1xf32>
    %272 = vector.extract_strided_slice %1 {offsets = [168, 0], sizes = [8, 1], strides = [1, 1]} : vector<176x1xf32> to vector<8x1xf32>
    %cst_69 = arith.constant dense<0.000000e+00> : vector<6x256xf32>
    %273 = tpu.matmul %267, %266, %cst_69 {dimension_numbers = #tpu.dot_dimension_numbers<[1], [0], [0], [1], [0, 0, 1, 1], [], []>} : vector<6x8xf32>, vector<8x256xf32>, vector<6x256xf32> -> vector<6x256xf32>
    %274 = vector.broadcast %269 : vector<6x1xf32> to vector<6x256xf32>
    %275 = arith.addf %273, %274 : vector<6x256xf32>
    %276 = vector.extract_strided_slice %275 {offsets = [0, 0], sizes = [4, 256], strides = [1, 1]} : vector<6x256xf32> to vector<4x256xf32>
    %277 = vector.extract_strided_slice %275 {offsets = [4, 0], sizes = [1, 256], strides = [1, 1]} : vector<6x256xf32> to vector<1x256xf32>
    %278 = vector.extract_strided_slice %275 {offsets = [5, 0], sizes = [1, 256], strides = [1, 1]} : vector<6x256xf32> to vector<1x256xf32>
    %279 = tpu.transpose %278, [1, 0] : vector<1x256xf32> -> vector<256x1xf32>
    %280 = vector.extract_strided_slice %279 {offsets = [0, 0], sizes = [128, 1], strides = [1, 1]} : vector<256x1xf32> to vector<128x1xf32>
    %281 = vector.extract_strided_slice %277 {offsets = [0, 0], sizes = [1, 128], strides = [1, 1]} : vector<1x256xf32> to vector<1x128xf32>
    %282 = vector.broadcast %280 : vector<128x1xf32> to vector<128x128xf32>
    %283 = vector.broadcast %281 : vector<1x128xf32> to vector<128x128xf32>
    %284 = arith.addf %282, %283 : vector<128x128xf32>
    %cst_70 = arith.constant 0.000000e+00 : f32
    %285 = vector.broadcast %cst_70 : f32 to vector<128x128xf32>
    %286 = arith.maximumf %284, %285 : vector<128x128xf32>
    %287 = vector.extract_strided_slice %276 {offsets = [0, 0], sizes = [4, 128], strides = [1, 1]} : vector<4x256xf32> to vector<4x128xf32>
    %cst_71 = arith.constant dense<0.000000e+00> : vector<4x128xf32>
    %288 = tpu.matmul %287, %286, %cst_71 {dimension_numbers = #tpu.dot_dimension_numbers<[1], [0], [0], [1], [0, 0, 1, 1], [], []>} : vector<4x128xf32>, vector<128x128xf32>, vector<4x128xf32> -> vector<4x128xf32>
    %289 = vector.extract_strided_slice %279 {offsets = [128, 0], sizes = [128, 1], strides = [1, 1]} : vector<256x1xf32> to vector<128x1xf32>
    %290 = vector.extract_strided_slice %277 {offsets = [0, 128], sizes = [1, 128], strides = [1, 1]} : vector<1x256xf32> to vector<1x128xf32>
    %291 = vector.broadcast %289 : vector<128x1xf32> to vector<128x128xf32>
    %292 = vector.broadcast %290 : vector<1x128xf32> to vector<128x128xf32>
    %293 = arith.addf %291, %292 : vector<128x128xf32>
    %cst_72 = arith.constant 0.000000e+00 : f32
    %294 = vector.broadcast %cst_72 : f32 to vector<128x128xf32>
    %295 = arith.maximumf %293, %294 : vector<128x128xf32>
    %296 = vector.extract_strided_slice %276 {offsets = [0, 128], sizes = [4, 128], strides = [1, 1]} : vector<4x256xf32> to vector<4x128xf32>
    %cst_73 = arith.constant dense<0.000000e+00> : vector<4x128xf32>
    %297 = tpu.matmul %296, %295, %cst_73 {dimension_numbers = #tpu.dot_dimension_numbers<[1], [0], [0], [1], [0, 0, 1, 1], [], []>} : vector<4x128xf32>, vector<128x128xf32>, vector<4x128xf32> -> vector<4x128xf32>
    %298 = tpu.concatenate %288, %297 in 1 : vector<4x128xf32>, vector<4x128xf32> -> vector<4x256xf32>
    %cst_74 = arith.constant 7.812500e-03 : f32
    %299 = vector.broadcast %cst_74 : f32 to vector<4x256xf32>
    %300 = arith.mulf %298, %299 : vector<4x256xf32>
    %cst_75 = arith.constant dense<0.000000e+00> : vector<8x256xf32>
    %301 = tpu.matmul %268, %300, %cst_75 {dimension_numbers = #tpu.dot_dimension_numbers<[1], [0], [0], [1], [0, 0, 1, 1], [], []>} : vector<8x4xf32>, vector<4x256xf32>, vector<8x256xf32> -> vector<8x256xf32>
    %302 = vector.broadcast %270 : vector<8x1xf32> to vector<8x256xf32>
    %303 = arith.addf %301, %302 : vector<8x256xf32>
    %cst_76 = arith.constant dense<0.000000e+00> : vector<8xf32>
    %304 = vector.multi_reduction <add>, %303, %cst_76 [1] : vector<8x256xf32> to vector<8xf32>
    %305 = vector.shape_cast %304 : vector<8xf32> to vector<8x1xf32>
    %cst_77 = arith.constant 2.560000e+02 : f32
    %306 = vector.broadcast %cst_77 : f32 to vector<8x1xf32>
    %307 = arith.divf %305, %306 : vector<8x1xf32>
    %308 = arith.mulf %303, %303 : vector<8x256xf32>
    %cst_78 = arith.constant dense<0.000000e+00> : vector<8xf32>
    %309 = vector.multi_reduction <add>, %308, %cst_78 [1] : vector<8x256xf32> to vector<8xf32>
    %310 = vector.shape_cast %309 : vector<8xf32> to vector<8x1xf32>
    %cst_79 = arith.constant 2.560000e+02 : f32
    %311 = vector.broadcast %cst_79 : f32 to vector<8x1xf32>
    %312 = arith.divf %310, %311 : vector<8x1xf32>
    %313 = arith.mulf %307, %307 : vector<8x1xf32>
    %314 = arith.subf %312, %313 : vector<8x1xf32>
    %cst_80 = arith.constant 9.99999974E-6 : f32
    %315 = vector.broadcast %cst_80 : f32 to vector<8x1xf32>
    %316 = arith.addf %314, %315 : vector<8x1xf32>
    %317 = math.rsqrt %316 : vector<8x1xf32>
    %318 = vector.broadcast %307 : vector<8x1xf32> to vector<8x256xf32>
    %319 = arith.subf %303, %318 : vector<8x256xf32>
    %320 = vector.broadcast %317 : vector<8x1xf32> to vector<8x256xf32>
    %321 = arith.mulf %319, %320 : vector<8x256xf32>
    %322 = vector.broadcast %271 : vector<8x1xf32> to vector<8x256xf32>
    %323 = arith.mulf %321, %322 : vector<8x256xf32>
    %324 = vector.broadcast %272 : vector<8x1xf32> to vector<8x256xf32>
    %325 = arith.addf %323, %324 : vector<8x256xf32>
    %326 = arith.addf %325, %266 : vector<8x256xf32>
    %327 = vector.extract_strided_slice %326 {offsets = [0, 0], sizes = [8, 128], strides = [1, 1]} : vector<8x256xf32> to vector<8x128xf32>
    %328 = vector.extract_strided_slice %326 {offsets = [0, 128], sizes = [8, 128], strides = [1, 1]} : vector<8x256xf32> to vector<8x128xf32>
    %329 = tpu.concatenate %327, %328 in 0 : vector<8x128xf32>, vector<8x128xf32> -> vector<16x128xf32>
    %c224 = arith.constant 224 : index
    %c0_81 = arith.constant 0 : index
    %330 = vector.load %arg1[%c224, %c0_81] : memref<512x128xf32, #tpu.memory_space<vmem>>, vector<128x64xf32>
    %cst_82 = arith.constant dense<0.000000e+00> : vector<16x64xf32>
    %331 = tpu.matmul %329, %330, %cst_82 {dimension_numbers = #tpu.dot_dimension_numbers<[1], [0], [0], [1], [0, 0, 1, 1], [], []>} : vector<16x128xf32>, vector<128x64xf32>, vector<16x64xf32> -> vector<16x64xf32>
    %332 = vector.extract_strided_slice %0 {offsets = [3, 0], sizes = [1, 64], strides = [1, 1]} : vector<8x128xf32> to vector<1x64xf32>
    %333 = vector.broadcast %332 : vector<1x64xf32> to vector<16x64xf32>
    %334 = arith.addf %331, %333 : vector<16x64xf32>
    %335 = vector.shape_cast %334 : vector<16x64xf32> to vector<2x8x64xf32>
    %cst_83 = arith.constant dense<0.000000e+00> : vector<8xf32>
    %336 = vector.multi_reduction <add>, %335, %cst_83 [0, 2] : vector<2x8x64xf32> to vector<8xf32>
    %337 = vector.shape_cast %336 : vector<8xf32> to vector<1x8x1xf32>
    %cst_84 = arith.constant 1.280000e+02 : f32
    %338 = vector.broadcast %cst_84 : f32 to vector<1x8x1xf32>
    %339 = arith.divf %337, %338 : vector<1x8x1xf32>
    %340 = arith.mulf %335, %335 : vector<2x8x64xf32>
    %cst_85 = arith.constant dense<0.000000e+00> : vector<8xf32>
    %341 = vector.multi_reduction <add>, %340, %cst_85 [0, 2] : vector<2x8x64xf32> to vector<8xf32>
    %342 = vector.shape_cast %341 : vector<8xf32> to vector<1x8x1xf32>
    %cst_86 = arith.constant 1.280000e+02 : f32
    %343 = vector.broadcast %cst_86 : f32 to vector<1x8x1xf32>
    %344 = arith.divf %342, %343 : vector<1x8x1xf32>
    %345 = arith.mulf %339, %339 : vector<1x8x1xf32>
    %346 = arith.subf %344, %345 : vector<1x8x1xf32>
    %cst_87 = arith.constant 9.99999974E-6 : f32
    %347 = vector.broadcast %cst_87 : f32 to vector<1x8x1xf32>
    %348 = arith.addf %346, %347 : vector<1x8x1xf32>
    %349 = math.rsqrt %348 : vector<1x8x1xf32>
    %350 = vector.extract_strided_slice %1 {offsets = [32, 0], sizes = [8, 1], strides = [1, 1]} : vector<176x1xf32> to vector<8x1xf32>
    %351 = vector.shape_cast %350 : vector<8x1xf32> to vector<1x8x1xf32>
    %352 = vector.extract_strided_slice %1 {offsets = [40, 0], sizes = [8, 1], strides = [1, 1]} : vector<176x1xf32> to vector<8x1xf32>
    %353 = vector.shape_cast %352 : vector<8x1xf32> to vector<1x8x1xf32>
    %354 = vector.broadcast %339 : vector<1x8x1xf32> to vector<2x8x64xf32>
    %355 = arith.subf %335, %354 : vector<2x8x64xf32>
    %356 = vector.broadcast %349 : vector<1x8x1xf32> to vector<2x8x64xf32>
    %357 = arith.mulf %355, %356 : vector<2x8x64xf32>
    %358 = vector.broadcast %351 : vector<1x8x1xf32> to vector<2x8x64xf32>
    %359 = arith.mulf %357, %358 : vector<2x8x64xf32>
    %360 = vector.broadcast %353 : vector<1x8x1xf32> to vector<2x8x64xf32>
    %361 = arith.addf %359, %360 : vector<2x8x64xf32>
    %362 = vector.shape_cast %361 : vector<2x8x64xf32> to vector<16x64xf32>
    %cst_88 = arith.constant 0.000000e+00 : f32
    %363 = vector.broadcast %cst_88 : f32 to vector<16x64xf32>
    %364 = arith.maximumf %362, %363 : vector<16x64xf32>
    %c352 = arith.constant 352 : index
    %c0_89 = arith.constant 0 : index
    %365 = vector.load %arg1[%c352, %c0_89] : memref<512x128xf32, #tpu.memory_space<vmem>>, vector<64x32xf32>
    %cst_90 = arith.constant dense<0.000000e+00> : vector<16x32xf32>
    %366 = tpu.matmul %364, %365, %cst_90 {dimension_numbers = #tpu.dot_dimension_numbers<[1], [0], [0], [1], [0, 0, 1, 1], [], []>} : vector<16x64xf32>, vector<64x32xf32>, vector<16x32xf32> -> vector<16x32xf32>
    %367 = vector.extract_strided_slice %0 {offsets = [4, 0], sizes = [1, 32], strides = [1, 1]} : vector<8x128xf32> to vector<1x32xf32>
    %368 = vector.broadcast %367 : vector<1x32xf32> to vector<16x32xf32>
    %369 = arith.addf %366, %368 : vector<16x32xf32>
    %cst_91 = arith.constant 0.000000e+00 : f32
    %370 = vector.broadcast %cst_91 : f32 to vector<16x32xf32>
    %371 = arith.maximumf %369, %370 : vector<16x32xf32>
    %c416 = arith.constant 416 : index
    %c0_92 = arith.constant 0 : index
    %372 = vector.load %arg1[%c416, %c0_92] : memref<512x128xf32, #tpu.memory_space<vmem>>, vector<32x8xf32>
    %cst_93 = arith.constant dense<0.000000e+00> : vector<16x8xf32>
    %373 = tpu.matmul %371, %372, %cst_93 {dimension_numbers = #tpu.dot_dimension_numbers<[1], [0], [0], [1], [0, 0, 1, 1], [], []>} : vector<16x32xf32>, vector<32x8xf32>, vector<16x8xf32> -> vector<16x8xf32>
    %374 = vector.extract_strided_slice %373 {offsets = [0, 0], sizes = [16, 1], strides = [1, 1]} : vector<16x8xf32> to vector<16x1xf32>
    %375 = vector.extract_strided_slice %0 {offsets = [5, 0], sizes = [1, 1], strides = [1, 1]} : vector<8x128xf32> to vector<1x1xf32>
    %376 = vector.broadcast %375 : vector<1x1xf32> to vector<16x1xf32>
    %377 = arith.addf %374, %376 : vector<16x1xf32>
    %378 = arith.negf %377 : vector<16x1xf32>
    %379 = math.exp %378 : vector<16x1xf32>
    %cst_94 = arith.constant 1.000000e+00 : f32
    %380 = vector.broadcast %cst_94 : f32 to vector<16x1xf32>
    %381 = arith.addf %380, %379 : vector<16x1xf32>
    %382 = arith.divf %380, %381 : vector<16x1xf32>
    %c0_95 = arith.constant 0 : index
    %c0_96 = arith.constant 0 : index
    %383 = vector.load %arg4[%c0_95, %c0_96] : memref<16x1xf32, #tpu.memory_space<vmem>>, vector<16x1xf32>
    tpu.vector_store %arg4[%c0_95, %c0_96], %382 {strides = array<i32>} : memref<16x1xf32, #tpu.memory_space<vmem>>, vector<16x1xf32>,
    return
  }
}

</mosaic_0001>

<bundles_post_ra>
// kernel: tpu_custom_call.1
= control target key start
LH: loop header
LB: loop body
LE: loop exit
PB: predicated region body
PF: predicated region fallthrough
CT: control target
= control target key end

     0   :  { %9 = vsyncpa [#allocation3], 0  ;;  %s4349_s15 = smov [#allocation2]   ;;  %s4848_s0 = inlined_call_operand.vmem [shape: f32[2,8,32], index: 0, kind: input, shape index: {}]   ;;  %s4849_s1 = inlined_call_operand.hbm [shape: f32[512,128], index: 1, kind: input, shape index: {}]   ;;  %s4850_s2 = inlined_call_operand.vmem [shape: f32[8,128], index: 2, kind: input, shape index: {}]   ;;  %s4851_s3 = inlined_call_operand.vmem [shape: f32[176,1], index: 3, kind: input, shape index: {}]   ;;  %s4852_s4 = inlined_call_operand.vmem [shape: f32[16,1], index: 4, kind: output, shape index: {}]  }
   0x1   :  { %s17_s16 = sshll.u32 %s4349_s15, 4  ;;  %s4325_s19 = scalar_lea.hbm %s4849_s1, 8192  ;;  %s18_s16 = int_to_ptr.vmem [resolvable:$true] %s17_s16 }
   0x2   :  { %p4326_p0 = scmp.ne.s32.totalorder %s4849_s1, %s4325_s19  ;;  %p4329_p1 = scmp.lt.u32.totalorder %s4325_s19, %s4849_s1 }
   0x4   :  { %p4331_p2 = pnand %p4329_p1, %p4326_p0 }
   0x6   :  { %4334 = shalt.err (!%p4331_p2)
}
   0x7   :  { %s4335_s24 = scalar_lea.vmem %s18_s16, 8192  ;;  %p4340_p4 = scmp.lt.s32.totalorder %s18_s16, %s18_s16 }
   0x8   :  { %p4336_p3 = scmp.ne.s32.totalorder %s18_s16, %s4335_s24  ;;  %p4341_p5 = scmp.lt.s32.totalorder %s4335_s24, %s4335_s24 }
   0xa   :  { %p4342_p6 = por %p4341_p5, %p4340_p4 }
   0xc   :  { %p4343_p7 = pnand %p4342_p6, %p4336_p3 }
   0xe   :  { %4346 = shalt.err (!%p4343_p7)
}
   0xf   :  { %s4350_s25 = smov 128   ;;  %s4351_s26 = smov 8  }
  0x10   :  { %23 = dma.hbm_to_vmem [thread:$0]  %s4849_s1, 8192, %s18_s16, [#allocation3], %s4350_s25, %s4350_s25, %s4351_s26  }
  0x11   :  { %4347 = dma.done.wait [#allocation3], 8192  }
  0x12   :  { %4348 = vsyncadd [#allocation3], 4294959104  ;;  %vm64_vm0 = vcmask 261120   ;;  %v56_v0 = vld [vmem:[#allocation2] sm:$0xff]  ;;  %v57_v1 = vld [vmem:[#allocation2 + $0x8] sm:$0xff]  ;;  %v4352_v9 = vmov 0   ;;  %v60_v11 = vlaneseq }
  0x13   :  { %v58_v2 = vld [vmem:[#allocation2 + $0x10] sm:$0xff]  ;;  %v3981_v3 = vpack.c.bf16 %v57_v1, %v56_v0  ;;  %v59_v4 = vld [vmem:[#allocation2 + $0x18] sm:$0xff]  ;;  %v54_v5 = vld [vmem:[%s4848_s0] sm:$0xff]  ;;  %4292 = vset.pattern.permute.xlu1 %v4352_v9  ;;  %4293 = vset.pattern.permute.xlu0 %v4352_v9  ;;  %vm146_vm1 = vcmask 523264   ;;  %vm428_vm2 = vcmask 64512   ;;  %vm4355_vm3 = vmmov 0  }
  0x14   :  { %v3985_v6 = vpack.c.bf16 %v59_v4, %v58_v2  ;;  %3579 = vmatprep.mubr.msk.f32.mxu0 %vm64_vm0, %v54_v5  ;;  %v55_v7 = vld [vmem:[%s4848_s0 + $0x8] sm:$0xff]  ;;  %v32_v8 = vld [vmem:[%s4851_s3] sm:$0xff]  ;;  %v4407_v12 = vshrl.u32 %v60_v11, 7  ;;  %v188_v31 = vld [vmem:[#allocation2 + $0x30] sm:$0xff]  ;;  %vm956_vm4 = vcmask 1043456   ;;  %vm952_vm5 = vcmask 31744  }
  0x15   :  { %3982 = vmatprep.subr.bf16.mxu0 %v3981_v3  ;;  %172 = vperm.xlu1 %4292, %v32_v8   ;;  %v33_v10 = vld [vmem:[%s4851_s3 + $0x8] sm:$0xff]  ;;  %v4413_v14 = vld [vmem:[%s4850_s2] sm:$0xff]  ;;  %v189_v32 = vld [vmem:[#allocation2 + $0x38] sm:$0xff]  ;;  %vm3331_vm6 = vcmask 7168  }
  0x16   :  { %3984 = vmatpush3.bf16.msra.mxu0 %v3981_v3  ;;  %v62_v13 = vsub.s32 0, %v4407_v12  ;;  %v186_v28 = vld [vmem:[#allocation2 + $0x20] sm:$0xff]  ;;  %v187_v29 = vld [vmem:[#allocation2 + $0x28] sm:$0xff]  ;;  %v3993_v33 = vpack.c.bf16 %v189_v32, %v188_v31  ;;  %v192_v37 = vld [vmem:[#allocation2 + $0x50] sm:$0xff]  ;;  %v196_v63 = vsub.s32 1, %v4407_v12 }
  0x17   :  { %3986 = vmatprep.subr.bf16.mxu0 %v3985_v6  ;;  %v3989_v30 = vpack.c.bf16 %v187_v29, %v186_v28  ;;  %v190_v34 = vld [vmem:[#allocation2 + $0x40] sm:$0xff]  ;;  %v191_v35 = vld [vmem:[#allocation2 + $0x48] sm:$0xff]  ;;  %v193_v38 = vld [vmem:[#allocation2 + $0x58] sm:$0xff] }
  0x18   :  { %v63_v15 = vrot.slane %v4413_v14, %v62_v13  ;;  %v3997_v36 = vpack.c.bf16 %v191_v35, %v190_v34  ;;  %v4001_v39 = vpack.c.bf16 %v193_v38, %v192_v37  ;;  %v314_v60 = vld [vmem:[#allocation2 + $0x60] sm:$0xff]  ;;  %v315_v61 = vld [vmem:[#allocation2 + $0x68] sm:$0xff]  ;;  %v197_v0 = vrot.slane %v4413_v14, %v196_v63  ;;  %v316_v9 = vld [vmem:[#allocation2 + $0x70] sm:$0xff] }
  0x19   :  { %179 = vperm.xlu1 %4292, %v33_v10   ;;  %3990 = vmatprep.subr.bf16.mxu1 %v3989_v30  ;;  %v4005_v62 = vpack.c.bf16 %v315_v61, %v314_v60  ;;  %v317_v10 = vld [vmem:[#allocation2 + $0x78] sm:$0xff]  ;;  %v318_v13 = vld [vmem:[#allocation2 + $0x80] sm:$0xff]  ;;  %v328_v32 = vld [vmem:[#allocation2 + $0xd0] sm:$0xff] }
  0x1a   :  { %3988 = vmatpush3.bf16.msra.mxu0 %v3985_v6  ;;  %3992 = vmatpush3.bf16.msra.mxu1 %v3989_v30  ;;  %v4009_v11 = vpack.c.bf16 %v317_v10, %v316_v9  ;;  %v326_v29 = vld [vmem:[#allocation2 + $0xc0] sm:$0xff]  ;;  %v327_v30 = vld [vmem:[#allocation2 + $0xc8] sm:$0xff] }
  0x1b   :  { %3994 = vmatprep.subr.bf16.mxu1 %v3993_v33  ;;  %4006 = vmatprep.subr.bf16.mxu0 %v4005_v62  ;;  %v4029_v31 = vpack.c.bf16 %v327_v30, %v326_v29 }
  0x1d   :  { %3580 = vmatmul.mubr.msk.f32.vlgmr.msra.gmra.mrb[0].mxu0 %vm64_vm0, %v55_v7 }
  0x1e   :  { %3996 = vmatpush3.bf16.msra.mxu1 %v3993_v33  ;;  %4008 = vmatpush3.bf16.msra.mxu0 %v4005_v62  ;;  %v329_v33 = vld [vmem:[#allocation2 + $0xd8] sm:$0xff] }
  0x1f   :  { %3998 = vmatprep.subr.bf16.mxu1 %v3997_v36  ;;  %4010 = vmatprep.subr.bf16.mxu0 %v4009_v11  ;;  %v4033_v34 = vpack.c.bf16 %v329_v33, %v328_v32 }
  0x22   :  { %4000 = vmatpush3.bf16.msra.mxu1 %v3997_v36  ;;  %4012 = vmatpush3.bf16.msra.mxu0 %v4009_v11 }
  0x23   :  { %4002 = vmatprep.subr.bf16.mxu1 %v4001_v39 }
  0x26   :  { %4004 = vmatpush3.bf16.msra.mxu1 %v4001_v39 }
  0x94   :  { %v173_v47 = vpop.permute.xlu1 %172 }
  0x98   :  { %v180_v55 = vpop.permute.xlu1 %179 }
  0xf0   :  { %v3581_v16 = vpop.f32.mrb[0].mxu0 }
  0xf1   :  { %v143_v17 = vadd.f32 %v3581_v16, %v63_v15  ;;  %v137_v18 = vpop.f32.mrb[1].mxu0  ;;  %v35_v16 = vld [vmem:[%s4851_s3 + $0x18] sm:$0xff] }
  0xf2   :  { %v138_v19 = vadd.f32 %v137_v18, %v63_v15  ;;  %v319_v15 = vld [vmem:[#allocation2 + $0x88] sm:$0xff]  ;;  %v34_v18 = vld [vmem:[%s4851_s3 + $0x10] sm:$0xff] }
  0xf3   :  { %v148_v20 = vsel %vm146_vm1, %v143_v17, 0.0  ;;  %v155_v21 = vmul.f32 %v143_v17, %v143_v17 }
  0xf4   :  { %v147_v22 = vsel %vm146_vm1, %v138_v19, 0.0  ;;  %v154_v23 = vmul.f32 %v138_v19, %v138_v19 }
  0xf5   :  { %v149_v24 = vadd.f32 %v148_v20, %v147_v22  ;;  %v157_v26 = vsel %vm146_vm1, %v155_v21, 0.0  ;;  %v321_v20 = vld [vmem:[#allocation2 + $0x98] sm:$0xff]  ;;  %v322_v22 = vld [vmem:[#allocation2 + $0xa0] sm:$0xff] }
  0xf6   :  { %v156_v25 = vsel %vm146_vm1, %v154_v23, 0.0  ;;  %v323_v23 = vld [vmem:[#allocation2 + $0xa8] sm:$0xff] }
  0xf7   :  { %150 = vadd.xlane.f32.xlu0 %v149_v24  ;;  %v158_v27 = vadd.f32 %v157_v26, %v156_v25  ;;  %v324_v24 = vld [vmem:[#allocation2 + $0xb0] sm:$0xff]  ;;  %v4021_v26 = vpack.c.bf16 %v323_v23, %v322_v22 }
  0xf8   :  { %v38_v25 = vld [vmem:[%s4851_s3 + $0x30] sm:$0xff] }
  0xfb   :  { %159 = vadd.xlane.f32.xlu0 %v158_v27  ;;  %v325_v27 = vld [vmem:[#allocation2 + $0xb8] sm:$0xff] }
  0xfc   :  { %v4025_v28 = vpack.c.bf16 %v325_v27, %v324_v24 }
 0x184   :  { %v151_v40 = vpop.xlane.xlu0 %150 }
 0x185   :  { %v153_v41 = vmul.f32 0.0078125, %v151_v40 }
 0x187   :  { %v162_v43 = vmul.f32 %v153_v41, %v153_v41  ;;  %v166_v48 = vsub.f32 %v138_v19, %v153_v41  ;;  %v167_v49 = vsub.f32 %v143_v17, %v153_v41  ;;  %v4013_v17 = vpack.c.bf16 %v319_v15, %v318_v13  ;;  %v320_v19 = vld [vmem:[#allocation2 + $0x90] sm:$0xff] }
 0x188   :  { %v160_v42 = vpop.xlane.xlu0 %159  ;;  %v4017_v21 = vpack.c.bf16 %v321_v20, %v320_v19 }
 0x189   :  { %v161_v44 = vmul.f32 0.0078125, %v160_v42  ;;  %4014 = vmatprep.subr.bf16.mxu0 %v4013_v17 }
 0x18a   :  { %4016 = vmatpush3.bf16.msra.mxu0 %v4013_v17 }
 0x18b   :  { %v163_v45 = vsub.f32 %v161_v44, %v162_v43  ;;  %4018 = vmatprep.subr.bf16.mxu0 %v4017_v21 }
 0x18d   :  { %v164_v46 = vadd.f32 1e-05, %v163_v45 }
 0x18e   :  { %4020 = vmatpush3.bf16.msra.mxu0 %v4017_v21  ;;  %v4354_v21 = vmov 0.0|0.0  }
 0x18f   :  { %4294 = vrsqrt.f32 %v164_v46  ;;  %4022 = vmatprep.subr.bf16.mxu0 %v4021_v26 }
 0x192   :  { %4024 = vmatpush3.bf16.msra.mxu0 %v4021_v26 }
 0x193   :  { %4026 = vmatprep.subr.bf16.mxu0 %v4025_v28 }
 0x196   :  { %4028 = vmatpush3.bf16.msra.mxu0 %v4025_v28 }
 0x197   :  { %4030 = vmatprep.subr.bf16.mxu0 %v4029_v31 }
 0x199   :  { %v4295_v50 = vpop.eup %4294 }
 0x19a   :  { %v168_v51 = vmul.f32 %v4295_v50, %v166_v48  ;;  %v169_v52 = vmul.f32 %v4295_v50, %v167_v49  ;;  %4032 = vmatpush3.bf16.msra.mxu0 %v4029_v31 }
 0x19b   :  { %4034 = vmatprep.subr.bf16.mxu0 %v4033_v34 }
 0x19c   :  { %v175_v53 = vmul.f32 %v173_v47, %v168_v51  ;;  %v176_v54 = vmul.f32 %v173_v47, %v169_v52 }
 0x19e   :  { %v182_v56 = vadd.f32 %v180_v55, %v175_v53  ;;  %v183_v57 = vadd.f32 %v180_v55, %v176_v54  ;;  %4036 = vmatpush3.bf16.msra.mxu0 %v4033_v34  ;;  %v4353_v55 = vmov 0.0  }
 0x19f   :  { %4061 = vmatprep.subr.bf16.mxu0 %v4354_v21 }
 0x1a0   :  { %v185_v58 = vmax.f32 %v183_v57, 0.0  ;;  %v184_v59 = vmax.f32 %v182_v56, 0.0  ;;  %v332_v56 = vsub.s32 2, %v4407_v12 }
 0x1a2   :  { %3598 = vmatprep.mubr.msk.f32.mxu1 %vm146_vm1, %v184_v59  ;;  %v333_v57 = vrot.slane %v4413_v14, %v332_v56 }
 0x1a3   :  { %3599 = vmatmul.mubr.msk.f32.vlgmr.msra.gmra.mrb[0].mxu1 %vm146_vm1, %v185_v58 }
 0x1a4   :  { %496 = vmatprep.mubr.f32.mxu1 %v4353_v55 }
 0x276   :  { %v3600_v1 = vpop.f32.mrb[0].mxu1 }
 0x277   :  { %v4424_v2 = vadd.f32 %v3600_v1, %v197_v0  ;;  %v270_v3 = vpop.f32.mrb[1].mxu1 }
 0x278   :  { %v271_v4 = vadd.f32 %v270_v3, %v197_v0 }
 0x279   :  { %v285_v5 = vmul.f32 %v4424_v2, %v4424_v2 }
 0x27a   :  { %v279_v6 = vadd.f32 %v4424_v2, %v271_v4  ;;  %v284_v7 = vmul.f32 %v271_v4, %v271_v4 }
 0x27c   :  { %280 = vadd.xlane.f32.xlu0 %v279_v6  ;;  %v286_v8 = vadd.f32 %v285_v5, %v284_v7  ;;  %v421_v5 = vld [vmem:[#allocation2 + $0x1c0] sm:$0x3f] }
 0x27e   :  { %287 = vadd.xlane.f32.xlu1 %v286_v8 }
 0x28f   :  { %307 = vperm.xlu1 %4292, %v35_v16  }
 0x292   :  { %300 = vperm.xlu0 %4293, %v34_v18  }
 0x296   :  { %425 = vperm.xlu0 %4293, %v38_v25  }
 0x309   :  { %v281_v35 = vpop.xlane.xlu0 %280 }
 0x30a   :  { %v283_v36 = vmul.f32 0.00390625, %v281_v35 }
 0x30b   :  { %v288_v37 = vpop.xlane.xlu1 %287 }
 0x30c   :  { %v289_v38 = vmul.f32 0.00390625, %v288_v37  ;;  %v290_v39 = vmul.f32 %v283_v36, %v283_v36  ;;  %v294_v42 = vsub.f32 %v271_v4, %v283_v36  ;;  %v295_v43 = vsub.f32 %v4424_v2, %v283_v36 }
 0x30e   :  { %v291_v40 = vsub.f32 %v289_v38, %v290_v39 }
 0x30f   :  { %v308_v50 = vpop.permute.xlu1 %307 }
 0x310   :  { %v292_v41 = vadd.f32 1e-05, %v291_v40 }
 0x311   :  { %v301_v47 = vpop.permute.xlu0 %300 }
 0x312   :  { %4296 = vrsqrt.f32 %v292_v41 }
 0x315   :  { %v426_v14 = vpop.permute.xlu0 %425 }
 0x31c   :  { %v4297_v44 = vpop.eup %4296 }
 0x31d   :  { %v296_v45 = vmul.f32 %v4297_v44, %v294_v42  ;;  %v297_v46 = vmul.f32 %v4297_v44, %v295_v43 }
 0x31f   :  { %v303_v48 = vmul.f32 %v301_v47, %v296_v45  ;;  %v304_v49 = vmul.f32 %v301_v47, %v297_v46 }
 0x321   :  { %v310_v51 = vadd.f32 %v308_v50, %v303_v48  ;;  %v311_v52 = vadd.f32 %v308_v50, %v304_v49  ;;  %v39_v48 = vld [vmem:[%s4851_s3 + $0x38] sm:$0xff]  ;;  %v4465_v49 = vsub.s32 4, %v4407_v12 }
 0x323   :  { %v313_v53 = vmax.f32 %v311_v52, 0.0  ;;  %v312_v54 = vmax.f32 %v310_v51, 0.0 }
 0x325   :  { %3633 = vmatprep.mubr.f32.mxu0 %v312_v54 }
 0x326   :  { %3634 = vmatmul.mubr.f32.vlgmr.msra.gmra.mrb[2].mxu0 %v313_v53 }
 0x327   :  { %3703 = vmatprep.mubr.msk.f32.mxu0 %vm4355_vm3, %v4353_v55 }
 0x3f9   :  { %v3635_v58 = vpop.f32.mrb[2].mxu0 }
 0x3fa   :  { %v406_v59 = vadd.f32 %v3635_v58, %v333_v57  ;;  %v400_v60 = vpop.f32.mrb[3].mxu0 }
 0x3fb   :  { %v401_v61 = vadd.f32 %v400_v60, %v333_v57 }
 0x3fc   :  { %v3344_v62 = vmul.f32 -1.442695, %v406_v59 }
 0x3fd   :  { %v3343_v63 = vmul.f32 -1.442695, %v401_v61 }
 0x3fe   :  { %4298 = vpow2.f32 %v3344_v62 }
 0x3ff   :  { %4300 = vpow2.f32 %v3343_v63 }
 0x408   :  { %v4299_v0 = vpop.eup %4298 }
 0x409   :  { %v4301_v1 = vpop.eup %4300  ;;  %v416_v2 = vadd.f32 1.0, %v4299_v0 }
 0x40a   :  { %v415_v3 = vadd.f32 1.0, %v4301_v1 }
 0x40b   :  { %4302 = vrcp.f32 %v416_v2 }
 0x40c   :  { %4304 = vrcp.f32 %v415_v3 }
 0x415   :  { %v4442_v4 = vpop.eup %4302 }
 0x416   :  { %v4444_v6 = vpop.eup %4304  ;;  %432 = vmatprep.subr.mxu1 %v4442_v4 }
 0x417   :  { %433 = vmatpush1.msra.mxu1 %v4444_v6 }
 0x418   :  { %3345 = vmatmul.mubr.msk.f32.vlgmr.msra.gmra.mrb[2].mxu1 %vm428_vm2, %v421_v5  ;;  %4037 = vmatprep.subr.bf16.mxu1 %v4354_v21 }
 0x419   :  { %3668 = vmatprep.mubr.msk.f32.mxu1 %vm4355_vm3, %v4353_v55 }
 0x4eb   :  { %v498_v7 = vpop.f32.mrb[2].mxu1 }
 0x4ec   :  { %v4449_v8 = vadd.f32 %v498_v7, %v426_v14  ;;  %v500_v9 = vpop.f32.mrb[3].mxu1 }
 0x4ed   :  { %v4451_v10 = vadd.f32 %v500_v9, %v426_v14 }
 0x4ee   :  { %v505_v11 = vrot.slane %v4449_v8, 5  ;;  %v4469_v51 = vrot.slane %v4449_v8, %v4465_v49 }
 0x4ef   :  { %v506_v13 = vrot.slane %v4451_v10, 5  ;;  %v4474_v56 = vrot.slane %v4451_v10, %v4465_v49 }
 0x4f0   :  { %509 = vxpose.xlu1.b32.start.end [1/1] (short) %v505_v11, 128 }
 0x4f1   :  { %541 = vxpose.xlu0.b32.start.end [1/1] (short) %v506_v13, 128 }
 0x570   :  { %v525_v15 = vpop.trf.xlu1 }
 0x571   :  { %v557_v16 = vpop.trf.xlu0  ;;  %575 = vperm.xlu0 %4293, %v525_v15  }
 0x574   :  { %v526_v17 = vpop.trf.xlu1 }
 0x575   :  { %v558_v18 = vpop.trf.xlu0  ;;  %761 = vperm.xlu0 %4293, %v557_v16   ;;  %580 = vperm.xlu1 %4292, %v526_v17  }
 0x578   :  { %v527_v19 = vpop.trf.xlu1 }
 0x579   :  { %v559_v20 = vpop.trf.xlu0  ;;  %766 = vperm.xlu1 %4292, %v558_v18   ;;  %585 = vperm.xlu0 %4293, %v527_v19  }
 0x57c   :  { %v528_v22 = vpop.trf.xlu1 }
 0x57d   :  { %v560_v23 = vpop.trf.xlu0  ;;  %771 = vperm.xlu0 %4293, %v559_v20   ;;  %590 = vperm.xlu1 %4292, %v528_v22  }
 0x580   :  { %v529_v24 = vpop.trf.xlu1 }
 0x581   :  { %v561_v25 = vpop.trf.xlu0  ;;  %776 = vperm.xlu1 %4292, %v560_v23   ;;  %595 = vperm.xlu0 %4293, %v529_v24  }
 0x584   :  { %v530_v26 = vpop.trf.xlu1 }
 0x585   :  { %v562_v27 = vpop.trf.xlu0  ;;  %781 = vperm.xlu0 %4293, %v561_v25   ;;  %600 = vperm.xlu1 %4292, %v530_v26  }
 0x588   :  { %v531_v28 = vpop.trf.xlu1 }
 0x589   :  { %v563_v29 = vpop.trf.xlu0  ;;  %786 = vperm.xlu1 %4292, %v562_v27   ;;  %605 = vperm.xlu0 %4293, %v531_v28  }
 0x58c   :  { %v532_v30 = vpop.trf.xlu1 }
 0x58d   :  { %v564_v31 = vpop.trf.xlu0  ;;  %791 = vperm.xlu0 %4293, %v563_v29   ;;  %610 = vperm.xlu1 %4292, %v532_v30  }
 0x590   :  { %v533_v32 = vpop.trf.xlu1 }
 0x591   :  { %v565_v33 = vpop.trf.xlu0  ;;  %796 = vperm.xlu1 %4292, %v564_v31   ;;  %615 = vperm.xlu0 %4293, %v533_v32  }
 0x594   :  { %v534_v34 = vpop.trf.xlu1 }
 0x595   :  { %v566_v35 = vpop.trf.xlu0  ;;  %801 = vperm.xlu0 %4293, %v565_v33   ;;  %620 = vperm.xlu1 %4292, %v534_v34  }
 0x598   :  { %v535_v36 = vpop.trf.xlu1 }
 0x599   :  { %v567_v37 = vpop.trf.xlu0  ;;  %806 = vperm.xlu1 %4292, %v566_v35   ;;  %625 = vperm.xlu0 %4293, %v535_v36  }
 0x59c   :  { %v536_v38 = vpop.trf.xlu1 }
 0x59d   :  { %v568_v39 = vpop.trf.xlu0  ;;  %811 = vperm.xlu0 %4293, %v567_v37   ;;  %630 = vperm.xlu1 %4292, %v536_v38  }
 0x5a0   :  { %v537_v40 = vpop.trf.xlu1 }
 0x5a1   :  { %v569_v41 = vpop.trf.xlu0  ;;  %816 = vperm.xlu1 %4292, %v568_v39   ;;  %635 = vperm.xlu0 %4293, %v537_v40  }
 0x5a4   :  { %v538_v42 = vpop.trf.xlu1 }
 0x5a5   :  { %v570_v43 = vpop.trf.xlu0  ;;  %821 = vperm.xlu0 %4293, %v569_v41   ;;  %640 = vperm.xlu1 %4292, %v538_v42  }
 0x5a8   :  { %v539_v45 = vpop.trf.xlu1 }
 0x5a9   :  { %v571_v44 = vpop.trf.xlu0  ;;  %826 = vperm.xlu1 %4292, %v570_v43  }
 0x5aa   :  { %831 = vperm.xlu0 %4293, %v571_v44  }
 0x5ac   :  { %v540_v47 = vpop.trf.xlu1 }
 0x5ad   :  { %v572_v46 = vpop.trf.xlu0 }
 0x5ae   :  { %836 = vperm.xlu1 %4292, %v572_v46   ;;  %645 = vperm.xlu0 %4293, %v539_v45  }
 0x5b2   :  { %949 = vperm.xlu0 %4293, %v39_v48   ;;  %650 = vperm.xlu1 %4292, %v540_v47  }
 0x5f0   :  { %v576_v50 = vpop.permute.xlu0 %575 }
 0x5f1   :  { %v657_v52 = vadd.f32 %v4469_v51, %v576_v50 }
 0x5f3   :  { %v673_v58 = vmax.f32 %v657_v52, 0.0 }
 0x5f4   :  { %v762_v53 = vpop.permute.xlu0 %761  ;;  %v581_v54 = vpop.permute.xlu1 %580 }
 0x5f5   :  { %v658_v57 = vadd.f32 %v4469_v51, %v581_v54  ;;  %v843_v59 = vadd.f32 %v4474_v56, %v762_v53 }
 0x5f7   :  { %v674_v60 = vmax.f32 %v658_v57, 0.0  ;;  %v859_v1 = vmax.f32 %v843_v59, 0.0 }
 0x5f8   :  { %v586_v61 = vpop.permute.xlu0 %585  ;;  %v767_v62 = vpop.permute.xlu1 %766 }
 0x5f9   :  { %v4038_v63 = vpack.c.bf16 %v674_v60, %v673_v58  ;;  %v844_v0 = vadd.f32 %v4474_v56, %v767_v62  ;;  %v659_v2 = vadd.f32 %v4469_v51, %v586_v61 }
 0x5fb   :  { %v860_v3 = vmax.f32 %v844_v0, 0.0  ;;  %4039 = vmatpush3.bf16.msra.mxu1 %v4038_v63  ;;  %v675_v11 = vmax.f32 %v659_v2, 0.0 }
 0x5fc   :  { %v772_v5 = vpop.permute.xlu0 %771  ;;  %v591_v14 = vpop.permute.xlu1 %590  ;;  %4040 = vmatprep.subr.bf16.mxu1 %v4354_v21 }
 0x5fd   :  { %v4062_v7 = vpack.c.bf16 %v860_v3, %v859_v1  ;;  %v660_v9 = vadd.f32 %v4469_v51, %v591_v14  ;;  %v845_v13 = vadd.f32 %v4474_v56, %v772_v5 }
 0x5ff   :  { %v676_v15 = vmax.f32 %v660_v9, 0.0  ;;  %4063 = vmatpush3.bf16.msra.mxu0 %v4062_v7  ;;  %v861_v20 = vmax.f32 %v845_v13, 0.0 }
 0x600   :  { %v596_v16 = vpop.permute.xlu0 %595  ;;  %v777_v17 = vpop.permute.xlu1 %776  ;;  %4064 = vmatprep.subr.bf16.mxu0 %v4354_v21 }
 0x601   :  { %v4041_v18 = vpack.c.bf16 %v676_v15, %v675_v11  ;;  %v846_v19 = vadd.f32 %v4474_v56, %v777_v17  ;;  %v661_v22 = vadd.f32 %v4469_v51, %v596_v16 }
 0x603   :  { %v862_v23 = vmax.f32 %v846_v19, 0.0  ;;  %4042 = vmatpush3.bf16.msra.mxu1 %v4041_v18  ;;  %v677_v28 = vmax.f32 %v661_v22, 0.0 }
 0x604   :  { %v782_v24 = vpop.permute.xlu0 %781  ;;  %v601_v25 = vpop.permute.xlu1 %600  ;;  %4043 = vmatprep.subr.bf16.mxu1 %v4354_v21 }
 0x605   :  { %v4065_v26 = vpack.c.bf16 %v862_v23, %v861_v20  ;;  %v662_v27 = vadd.f32 %v4469_v51, %v601_v25  ;;  %v847_v29 = vadd.f32 %v4474_v56, %v782_v24 }
 0x607   :  { %v678_v30 = vmax.f32 %v662_v27, 0.0  ;;  %4066 = vmatpush3.bf16.msra.mxu0 %v4065_v26  ;;  %v863_v35 = vmax.f32 %v847_v29, 0.0 }
 0x608   :  { %v606_v31 = vpop.permute.xlu0 %605  ;;  %v787_v32 = vpop.permute.xlu1 %786  ;;  %4067 = vmatprep.subr.bf16.mxu0 %v4354_v21 }
 0x609   :  { %v4044_v33 = vpack.c.bf16 %v678_v30, %v677_v28  ;;  %v848_v34 = vadd.f32 %v4474_v56, %v787_v32  ;;  %v663_v36 = vadd.f32 %v4469_v51, %v606_v31 }
 0x60b   :  { %v864_v37 = vmax.f32 %v848_v34, 0.0  ;;  %4045 = vmatpush3.bf16.msra.mxu1 %v4044_v33  ;;  %v679_v42 = vmax.f32 %v663_v36, 0.0 }
 0x60c   :  { %v792_v38 = vpop.permute.xlu0 %791  ;;  %v611_v39 = vpop.permute.xlu1 %610  ;;  %4046 = vmatprep.subr.bf16.mxu1 %v4354_v21 }
 0x60d   :  { %v4068_v40 = vpack.c.bf16 %v864_v37, %v863_v35  ;;  %v664_v41 = vadd.f32 %v4469_v51, %v611_v39  ;;  %v849_v43 = vadd.f32 %v4474_v56, %v792_v38 }
 0x60f   :  { %v680_v44 = vmax.f32 %v664_v41, 0.0  ;;  %4069 = vmatpush3.bf16.msra.mxu0 %v4068_v40  ;;  %v865_v50 = vmax.f32 %v849_v43, 0.0 }
 0x610   :  { %v616_v45 = vpop.permute.xlu0 %615  ;;  %v797_v46 = vpop.permute.xlu1 %796  ;;  %4070 = vmatprep.subr.bf16.mxu0 %v4354_v21 }
 0x611   :  { %v4047_v47 = vpack.c.bf16 %v680_v44, %v679_v42  ;;  %v850_v48 = vadd.f32 %v4474_v56, %v797_v46  ;;  %v665_v52 = vadd.f32 %v4469_v51, %v616_v45 }
 0x613   :  { %v866_v53 = vmax.f32 %v850_v48, 0.0  ;;  %4048 = vmatpush3.bf16.msra.mxu1 %v4047_v47  ;;  %v681_v60 = vmax.f32 %v665_v52, 0.0 }
 0x614   :  { %v802_v54 = vpop.permute.xlu0 %801  ;;  %v621_v57 = vpop.permute.xlu1 %620  ;;  %4049 = vmatprep.subr.bf16.mxu1 %v4354_v21 }
 0x615   :  { %v4071_v58 = vpack.c.bf16 %v866_v53, %v865_v50  ;;  %v666_v59 = vadd.f32 %v4469_v51, %v621_v57  ;;  %v851_v61 = vadd.f32 %v4474_v56, %v802_v54 }
 0x617   :  { %v682_v62 = vmax.f32 %v666_v59, 0.0  ;;  %4072 = vmatpush3.bf16.msra.mxu0 %v4071_v58  ;;  %v867_v3 = vmax.f32 %v851_v61, 0.0  ;;  %v422_v61 = vld [vmem:[#allocation2 + $0x1c8] sm:$0xff] }
 0x618   :  { %v626_v63 = vpop.permute.xlu0 %625  ;;  %v807_v0 = vpop.permute.xlu1 %806  ;;  %4073 = vmatprep.subr.bf16.mxu0 %v4354_v21 }
 0x619   :  { %v4050_v1 = vpack.c.bf16 %v682_v62, %v681_v60  ;;  %v852_v2 = vadd.f32 %v4474_v56, %v807_v0  ;;  %v667_v5 = vadd.f32 %v4469_v51, %v626_v63 }
 0x61b   :  { %v868_v14 = vmax.f32 %v852_v2, 0.0  ;;  %4051 = vmatpush3.bf16.msra.mxu1 %v4050_v1  ;;  %v683_v15 = vmax.f32 %v667_v5, 0.0 }
 0x61c   :  { %v812_v7 = vpop.permute.xlu0 %811  ;;  %v631_v9 = vpop.permute.xlu1 %630  ;;  %4052 = vmatprep.subr.bf16.mxu1 %v4354_v21 }
 0x61d   :  { %v4074_v11 = vpack.c.bf16 %v868_v14, %v867_v3  ;;  %v668_v13 = vadd.f32 %v4469_v51, %v631_v9  ;;  %v853_v16 = vadd.f32 %v4474_v56, %v812_v7  ;;  %v41_v14 = vld [vmem:[%s4851_s3 + $0x48] sm:$0xff]  ;;  %v42_v7 = vld [vmem:[%s4851_s3 + $0x50] sm:$0xff]  ;;  %v40_v9 = vld [vmem:[%s4851_s3 + $0x40] sm:$0xff] }
 0x61f   :  { %v684_v17 = vmax.f32 %v668_v13, 0.0  ;;  %4075 = vmatpush3.bf16.msra.mxu0 %v4074_v11  ;;  %v869_v23 = vmax.f32 %v853_v16, 0.0 }
 0x620   :  { %v636_v18 = vpop.permute.xlu0 %635  ;;  %v817_v19 = vpop.permute.xlu1 %816  ;;  %4076 = vmatprep.subr.bf16.mxu0 %v4354_v21 }
 0x621   :  { %v4053_v20 = vpack.c.bf16 %v684_v17, %v683_v15  ;;  %v854_v22 = vadd.f32 %v4474_v56, %v817_v19  ;;  %v669_v24 = vadd.f32 %v4469_v51, %v636_v18 }
 0x623   :  { %v870_v25 = vmax.f32 %v854_v22, 0.0  ;;  %4054 = vmatpush3.bf16.msra.mxu1 %v4053_v20  ;;  %v685_v30 = vmax.f32 %v669_v24, 0.0 }
 0x624   :  { %v822_v26 = vpop.permute.xlu0 %821  ;;  %v641_v27 = vpop.permute.xlu1 %640  ;;  %4055 = vmatprep.subr.bf16.mxu1 %v4354_v21 }
 0x625   :  { %v4077_v28 = vpack.c.bf16 %v870_v25, %v869_v23  ;;  %v670_v29 = vadd.f32 %v4469_v51, %v641_v27  ;;  %v855_v31 = vadd.f32 %v4474_v56, %v822_v26 }
 0x627   :  { %v686_v32 = vmax.f32 %v670_v29, 0.0  ;;  %4078 = vmatpush3.bf16.msra.mxu0 %v4077_v28  ;;  %v871_v37 = vmax.f32 %v855_v31, 0.0 }
 0x628   :  { %v827_v33 = vpop.permute.xlu1 %826  ;;  %4079 = vmatprep.subr.bf16.mxu0 %v4354_v21 }
 0x629   :  { %v4056_v34 = vpack.c.bf16 %v686_v32, %v685_v30  ;;  %v856_v35 = vadd.f32 %v4474_v56, %v827_v33  ;;  %v832_v36 = vpop.permute.xlu0 %831 }
 0x62a   :  { %v857_v39 = vadd.f32 %v4474_v56, %v832_v36 }
 0x62b   :  { %v872_v38 = vmax.f32 %v856_v35, 0.0  ;;  %4057 = vmatpush3.bf16.msra.mxu1 %v4056_v34  ;;  %v1068_v34 = vld [vmem:[#allocation2 + $0x1d0] sm:$0x3f] }
 0x62c   :  { %4058 = vmatprep.subr.bf16.mxu1 %v4354_v21  ;;  %v873_v44 = vmax.f32 %v857_v39, 0.0 }
 0x62d   :  { %v4080_v40 = vpack.c.bf16 %v872_v38, %v871_v37  ;;  %v646_v41 = vpop.permute.xlu0 %645  ;;  %v837_v42 = vpop.permute.xlu1 %836 }
 0x62e   :  { %v858_v43 = vadd.f32 %v4474_v56, %v837_v42  ;;  %v671_v45 = vadd.f32 %v4469_v51, %v646_v41 }
 0x62f   :  { %4081 = vmatpush3.bf16.msra.mxu0 %v4080_v40 }
 0x630   :  { %v874_v46 = vmax.f32 %v858_v43, 0.0  ;;  %4082 = vmatprep.subr.bf16.mxu0 %v4354_v21  ;;  %v687_v52 = vmax.f32 %v671_v45, 0.0 }
 0x631   :  { %v651_v47 = vpop.permute.xlu1 %650 }
 0x632   :  { %v4083_v48 = vpack.c.bf16 %v874_v46, %v873_v44  ;;  %v672_v50 = vadd.f32 %v4469_v51, %v651_v47 }
 0x634   :  { %v688_v53 = vmax.f32 %v672_v50, 0.0  ;;  %4084 = vmatpush3.bf16.msra.mxu0 %v4083_v48 }
 0x635   :  { %4109 = vmatprep.subr.bf16.mxu0 %v4354_v21 }
 0x636   :  { %v4059_v54 = vpack.c.bf16 %v688_v53, %v687_v52 }
 0x637   :  { %3704 = vmatmul.mubr.f32.vlgmr.msra.gmra.mrb[4].mxu0 %v4451_v10 }
 0x638   :  { %4060 = vmatpush3.bf16.msra.mxu1 %v4059_v54  ;;  %3773 = vmatprep.mubr.msk.f32.mxu0 %vm4355_vm3, %v4353_v55 }
 0x63b   :  { %3669 = vmatmul.mubr.f32.vlgmr.msra.gmra.mrb[4].mxu1 %v4449_v8  ;;  %v950_v8 = vpop.permute.xlu0 %949 }
 0x63c   :  { %1027 = vmatprep.mubr.f32.mxu1 %v4353_v55 }
 0x70a   :  { %v941_v56 = vpop.f32.mrb[4].mxu0 }
 0x70b   :  { %v946_v57 = vmul.f32 0.0078125, %v941_v56  ;;  %v3705_v51 = vpop.f32.mrb[5].mxu0 }
 0x70d   :  { %3346 = vmatprep.subr.msk.mxu1 %vm956_vm4, %v946_v57 }
 0x70e   :  { %v755_v58 = vpop.f32.mrb[4].mxu1 }
 0x70f   :  { %v945_v59 = vmul.f32 0.0078125, %v755_v58  ;;  %v3670_v60 = vpop.f32.mrb[5].mxu1 }
 0x711   :  { %3347 = vmatpush1.msk.msra.mxu1 %vm956_vm4, %v945_v59 }
 0x712   :  { %3348 = vmatmul.mubr.msk.f32.vlgmr.msra.gmra.mrb[6].mxu1 %vm952_vm5, %v422_v61 }
 0x713   :  { %1142 = vmatprep.mubr.f32.mxu1 %v4353_v55 }
 0x7e5   :  { %v1029_v10 = vpop.f32.mrb[6].mxu1 }
 0x7e6   :  { %v1030_v62 = vadd.f32 %v1029_v10, %v950_v8  ;;  %v1031_v63 = vpop.f32.mrb[7].mxu1 }
 0x7e7   :  { %v1032_v0 = vadd.f32 %v1031_v63, %v950_v8 }
 0x7e8   :  { %v1038_v1 = vmul.f32 %v1030_v62, %v1030_v62 }
 0x7e9   :  { %v1034_v2 = vadd.f32 %v1032_v0, %v1030_v62  ;;  %v1039_v3 = vmul.f32 %v1032_v0, %v1032_v0 }
 0x7eb   :  { %1035 = vadd.xlane.f32.xlu1 %v1034_v2  ;;  %v1040_v5 = vadd.f32 %v1039_v3, %v1038_v1 }
 0x7ed   :  { %1041 = vadd.xlane.f32.xlu0 %v1040_v5 }
 0x7fc   :  { %1061 = vperm.xlu1 %4292, %v41_v14  }
 0x800   :  { %1072 = vperm.xlu1 %4292, %v42_v7  }
 0x803   :  { %1054 = vperm.xlu0 %4293, %v40_v9  }
 0x878   :  { %v1036_v11 = vpop.xlane.xlu1 %1035 }
 0x879   :  { %v1037_v13 = vmul.f32 0.00390625, %v1036_v11  ;;  %v43_v11 = vld [vmem:[%s4851_s3 + $0x58] sm:$0xff] }
 0x87a   :  { %v1042_v15 = vpop.xlane.xlu0 %1041 }
 0x87b   :  { %v1043_v16 = vmul.f32 0.00390625, %v1042_v15  ;;  %v1044_v17 = vmul.f32 %v1037_v13, %v1037_v13  ;;  %v1048_v20 = vsub.f32 %v1030_v62, %v1037_v13  ;;  %v1049_v22 = vsub.f32 %v1032_v0, %v1037_v13 }
 0x87c   :  { %v1062_v29 = vpop.permute.xlu1 %1061 }
 0x87d   :  { %v1045_v18 = vsub.f32 %v1043_v16, %v1044_v17 }
 0x87f   :  { %v1046_v19 = vadd.f32 1e-05, %v1045_v18 }
 0x880   :  { %v1073_v35 = vpop.permute.xlu1 %1072 }
 0x881   :  { %4306 = vrsqrt.f32 %v1046_v19 }
 0x882   :  { %v1055_v26 = vpop.permute.xlu0 %1054 }
 0x88b   :  { %v4307_v23 = vpop.eup %4306 }
 0x88c   :  { %v1050_v24 = vmul.f32 %v4307_v23, %v1048_v20  ;;  %v1051_v25 = vmul.f32 %v4307_v23, %v1049_v22 }
 0x88e   :  { %v1057_v27 = vmul.f32 %v1055_v26, %v1050_v24  ;;  %v1058_v28 = vmul.f32 %v1055_v26, %v1051_v25 }
 0x890   :  { %v1064_v30 = vadd.f32 %v1062_v29, %v1057_v27  ;;  %v1065_v31 = vadd.f32 %v1062_v29, %v1058_v28 }
 0x892   :  { %v4541_v32 = vadd.f32 %v4444_v6, %v1064_v30  ;;  %v4544_v33 = vadd.f32 %v4442_v4, %v1065_v31 }
 0x894   :  { %1078 = vmatprep.subr.mxu1 %v4544_v33 }
 0x895   :  { %1079 = vmatpush1.msra.mxu1 %v4541_v32 }
 0x896   :  { %3349 = vmatmul.mubr.msk.f32.vlgmr.msra.gmra.mrb[8].mxu1 %vm428_vm2, %v1068_v34  ;;  %4085 = vmatprep.subr.bf16.mxu1 %v4354_v21 }
 0x897   :  { %3738 = vmatprep.mubr.msk.f32.mxu1 %vm4355_vm3, %v4353_v55 }
 0x969   :  { %v1144_v36 = vpop.f32.mrb[8].mxu1 }
 0x96a   :  { %v4552_v37 = vadd.f32 %v1144_v36, %v1073_v35  ;;  %v1146_v6 = vpop.f32.mrb[9].mxu1 }
 0x96b   :  { %v4554_v38 = vadd.f32 %v1146_v6, %v1073_v35 }
 0x96c   :  { %v1151_v4 = vrot.slane %v4552_v37, 5  ;;  %v4563_v15 = vrot.slane %v4552_v37, %v4465_v49 }
 0x96d   :  { %v1152_v39 = vrot.slane %v4554_v38, 5  ;;  %v4568_v19 = vrot.slane %v4554_v38, %v4465_v49 }
 0x96e   :  { %1155 = vxpose.xlu1.b32.start.end [1/1] (short) %v1151_v4, 128 }
 0x96f   :  { %1187 = vxpose.xlu0.b32.start.end [1/1] (short) %v1152_v39, 128 }
 0x9ee   :  { %v1171_v40 = vpop.trf.xlu1 }
 0x9ef   :  { %v1203_v41 = vpop.trf.xlu0  ;;  %1221 = vperm.xlu0 %4293, %v1171_v40  }
 0x9f2   :  { %v1172_v42 = vpop.trf.xlu1 }
 0x9f3   :  { %v1204_v43 = vpop.trf.xlu0  ;;  %1407 = vperm.xlu0 %4293, %v1203_v41   ;;  %1226 = vperm.xlu1 %4292, %v1172_v42  }
 0x9f6   :  { %v1173_v44 = vpop.trf.xlu1 }
 0x9f7   :  { %v1205_v45 = vpop.trf.xlu0  ;;  %1412 = vperm.xlu1 %4292, %v1204_v43   ;;  %1231 = vperm.xlu0 %4293, %v1173_v44  }
 0x9fa   :  { %v1174_v46 = vpop.trf.xlu1 }
 0x9fb   :  { %v1206_v47 = vpop.trf.xlu0  ;;  %1417 = vperm.xlu0 %4293, %v1205_v45   ;;  %1236 = vperm.xlu1 %4292, %v1174_v46  }
 0x9fe   :  { %v1175_v48 = vpop.trf.xlu1 }
 0x9ff   :  { %v1207_v50 = vpop.trf.xlu0  ;;  %1422 = vperm.xlu1 %4292, %v1206_v47   ;;  %1241 = vperm.xlu0 %4293, %v1175_v48  }
 0xa02   :  { %v1176_v52 = vpop.trf.xlu1 }
 0xa03   :  { %v1208_v53 = vpop.trf.xlu0  ;;  %1427 = vperm.xlu0 %4293, %v1207_v50   ;;  %1246 = vperm.xlu1 %4292, %v1176_v52  }
 0xa06   :  { %v1177_v54 = vpop.trf.xlu1 }
 0xa07   :  { %v1209_v56 = vpop.trf.xlu0  ;;  %1432 = vperm.xlu1 %4292, %v1208_v53   ;;  %1251 = vperm.xlu0 %4293, %v1177_v54  }
 0xa0a   :  { %v1178_v57 = vpop.trf.xlu1 }
 0xa0b   :  { %v1210_v51 = vpop.trf.xlu0  ;;  %1437 = vperm.xlu0 %4293, %v1209_v56   ;;  %1256 = vperm.xlu1 %4292, %v1178_v57  }
 0xa0e   :  { %v1179_v58 = vpop.trf.xlu1 }
 0xa0f   :  { %v1211_v59 = vpop.trf.xlu0  ;;  %1442 = vperm.xlu1 %4292, %v1210_v51   ;;  %1261 = vperm.xlu0 %4293, %v1179_v58  }
 0xa12   :  { %v1180_v60 = vpop.trf.xlu1 }
 0xa13   :  { %v1212_v61 = vpop.trf.xlu0  ;;  %1447 = vperm.xlu0 %4293, %v1211_v59   ;;  %1266 = vperm.xlu1 %4292, %v1180_v60  }
 0xa16   :  { %v1181_v8 = vpop.trf.xlu1 }
 0xa17   :  { %v1213_v10 = vpop.trf.xlu0  ;;  %1452 = vperm.xlu1 %4292, %v1212_v61   ;;  %1271 = vperm.xlu0 %4293, %v1181_v8  }
 0xa1a   :  { %v1182_v62 = vpop.trf.xlu1 }
 0xa1b   :  { %v1214_v63 = vpop.trf.xlu0  ;;  %1457 = vperm.xlu0 %4293, %v1213_v10   ;;  %1276 = vperm.xlu1 %4292, %v1182_v62  }
 0xa1e   :  { %v1183_v0 = vpop.trf.xlu1 }
 0xa1f   :  { %v1215_v1 = vpop.trf.xlu0  ;;  %1462 = vperm.xlu1 %4292, %v1214_v63   ;;  %1281 = vperm.xlu0 %4293, %v1183_v0  }
 0xa22   :  { %v1184_v2 = vpop.trf.xlu1 }
 0xa23   :  { %v1216_v3 = vpop.trf.xlu0  ;;  %1467 = vperm.xlu0 %4293, %v1215_v1   ;;  %1286 = vperm.xlu1 %4292, %v1184_v2  }
 0xa26   :  { %v1185_v14 = vpop.trf.xlu1 }
 0xa27   :  { %v1217_v5 = vpop.trf.xlu0  ;;  %1472 = vperm.xlu1 %4292, %v1216_v3  }
 0xa28   :  { %1477 = vperm.xlu0 %4293, %v1217_v5  }
 0xa2a   :  { %v1186_v9 = vpop.trf.xlu1 }
 0xa2b   :  { %v1218_v7 = vpop.trf.xlu0 }
 0xa2c   :  { %1482 = vperm.xlu1 %4292, %v1218_v7   ;;  %1291 = vperm.xlu0 %4293, %v1185_v14  }
 0xa30   :  { %1595 = vperm.xlu0 %4293, %v43_v11   ;;  %1296 = vperm.xlu1 %4292, %v1186_v9  }
 0xa6e   :  { %v1222_v13 = vpop.permute.xlu0 %1221 }
 0xa6f   :  { %v1303_v16 = vadd.f32 %v4563_v15, %v1222_v13 }
 0xa71   :  { %v1319_v22 = vmax.f32 %v1303_v16, 0.0 }
 0xa72   :  { %v1408_v17 = vpop.permute.xlu0 %1407  ;;  %v1227_v18 = vpop.permute.xlu1 %1226 }
 0xa73   :  { %v1304_v20 = vadd.f32 %v4563_v15, %v1227_v18  ;;  %v1489_v23 = vadd.f32 %v4568_v19, %v1408_v17 }
 0xa75   :  { %v1320_v24 = vmax.f32 %v1304_v20, 0.0  ;;  %v1505_v29 = vmax.f32 %v1489_v23, 0.0 }
 0xa76   :  { %v1232_v25 = vpop.permute.xlu0 %1231  ;;  %v1413_v26 = vpop.permute.xlu1 %1412 }
 0xa77   :  { %v4086_v27 = vpack.c.bf16 %v1320_v24, %v1319_v22  ;;  %v1490_v28 = vadd.f32 %v4568_v19, %v1413_v26  ;;  %v1305_v30 = vadd.f32 %v4563_v15, %v1232_v25 }
 0xa79   :  { %v1506_v31 = vmax.f32 %v1490_v28, 0.0  ;;  %4087 = vmatpush3.bf16.msra.mxu1 %v4086_v27  ;;  %v1321_v4 = vmax.f32 %v1305_v30, 0.0 }
 0xa7a   :  { %v1418_v34 = vpop.permute.xlu0 %1417  ;;  %v1237_v35 = vpop.permute.xlu1 %1236  ;;  %4088 = vmatprep.subr.bf16.mxu1 %v4354_v21 }
 0xa7b   :  { %v4110_v36 = vpack.c.bf16 %v1506_v31, %v1505_v29  ;;  %v1306_v6 = vadd.f32 %v4563_v15, %v1237_v35  ;;  %v1491_v39 = vadd.f32 %v4568_v19, %v1418_v34 }
 0xa7d   :  { %v1322_v40 = vmax.f32 %v1306_v6, 0.0  ;;  %4111 = vmatpush3.bf16.msra.mxu0 %v4110_v36  ;;  %v1507_v45 = vmax.f32 %v1491_v39, 0.0 }
 0xa7e   :  { %v1242_v41 = vpop.permute.xlu0 %1241  ;;  %v1423_v42 = vpop.permute.xlu1 %1422  ;;  %4112 = vmatprep.subr.bf16.mxu0 %v4354_v21 }
 0xa7f   :  { %v4089_v43 = vpack.c.bf16 %v1322_v40, %v1321_v4  ;;  %v1492_v44 = vadd.f32 %v4568_v19, %v1423_v42  ;;  %v1307_v46 = vadd.f32 %v4563_v15, %v1242_v41 }
 0xa81   :  { %v1508_v47 = vmax.f32 %v1492_v44, 0.0  ;;  %4090 = vmatpush3.bf16.msra.mxu1 %v4089_v43  ;;  %v1323_v54 = vmax.f32 %v1307_v46, 0.0 }
 0xa82   :  { %v1428_v48 = vpop.permute.xlu0 %1427  ;;  %v1247_v50 = vpop.permute.xlu1 %1246  ;;  %4091 = vmatprep.subr.bf16.mxu1 %v4354_v21 }
 0xa83   :  { %v4113_v52 = vpack.c.bf16 %v1508_v47, %v1507_v45  ;;  %v1308_v53 = vadd.f32 %v4563_v15, %v1247_v50  ;;  %v1493_v56 = vadd.f32 %v4568_v19, %v1428_v48 }
 0xa85   :  { %v1324_v57 = vmax.f32 %v1308_v53, 0.0  ;;  %4114 = vmatpush3.bf16.msra.mxu0 %v4113_v52  ;;  %v1509_v61 = vmax.f32 %v1493_v56, 0.0 }
 0xa86   :  { %v1252_v51 = vpop.permute.xlu0 %1251  ;;  %v1433_v58 = vpop.permute.xlu1 %1432  ;;  %4115 = vmatprep.subr.bf16.mxu0 %v4354_v21 }
 0xa87   :  { %v4092_v59 = vpack.c.bf16 %v1324_v57, %v1323_v54  ;;  %v1494_v60 = vadd.f32 %v4568_v19, %v1433_v58  ;;  %v1309_v8 = vadd.f32 %v4563_v15, %v1252_v51 }
 0xa89   :  { %v1510_v10 = vmax.f32 %v1494_v60, 0.0  ;;  %4093 = vmatpush3.bf16.msra.mxu1 %v4092_v59  ;;  %v1325_v2 = vmax.f32 %v1309_v8, 0.0 }
 0xa8a   :  { %v1438_v62 = vpop.permute.xlu0 %1437  ;;  %v1257_v63 = vpop.permute.xlu1 %1256  ;;  %4094 = vmatprep.subr.bf16.mxu1 %v4354_v21 }
 0xa8b   :  { %v4116_v0 = vpack.c.bf16 %v1510_v10, %v1509_v61  ;;  %v1310_v1 = vadd.f32 %v4563_v15, %v1257_v63  ;;  %v1495_v3 = vadd.f32 %v4568_v19, %v1438_v62 }
 0xa8d   :  { %v1326_v5 = vmax.f32 %v1310_v1, 0.0  ;;  %4117 = vmatpush3.bf16.msra.mxu0 %v4116_v0  ;;  %v1511_v13 = vmax.f32 %v1495_v3, 0.0 }
 0xa8e   :  { %v1262_v14 = vpop.permute.xlu0 %1261  ;;  %v1443_v7 = vpop.permute.xlu1 %1442  ;;  %4118 = vmatprep.subr.bf16.mxu0 %v4354_v21 }
 0xa8f   :  { %v4095_v9 = vpack.c.bf16 %v1326_v5, %v1325_v2  ;;  %v1496_v11 = vadd.f32 %v4568_v19, %v1443_v7  ;;  %v1311_v16 = vadd.f32 %v4563_v15, %v1262_v14 }
 0xa91   :  { %v1512_v17 = vmax.f32 %v1496_v11, 0.0  ;;  %4096 = vmatpush3.bf16.msra.mxu1 %v4095_v9  ;;  %v1327_v24 = vmax.f32 %v1311_v16, 0.0 }
 0xa92   :  { %v1448_v18 = vpop.permute.xlu0 %1447  ;;  %v1267_v20 = vpop.permute.xlu1 %1266  ;;  %4097 = vmatprep.subr.bf16.mxu1 %v4354_v21 }
 0xa93   :  { %v4119_v22 = vpack.c.bf16 %v1512_v17, %v1511_v13  ;;  %v1312_v23 = vadd.f32 %v4563_v15, %v1267_v20  ;;  %v1497_v25 = vadd.f32 %v4568_v19, %v1448_v18 }
 0xa95   :  { %v1328_v26 = vmax.f32 %v1312_v23, 0.0  ;;  %4120 = vmatpush3.bf16.msra.mxu0 %v4119_v22  ;;  %v1513_v31 = vmax.f32 %v1497_v25, 0.0  ;;  %v1069_v25 = vld [vmem:[#allocation2 + $0x1d8] sm:$0xff] }
 0xa96   :  { %v1272_v27 = vpop.permute.xlu0 %1271  ;;  %v1453_v28 = vpop.permute.xlu1 %1452  ;;  %4121 = vmatprep.subr.bf16.mxu0 %v4354_v21 }
 0xa97   :  { %v4098_v29 = vpack.c.bf16 %v1328_v26, %v1327_v24  ;;  %v1498_v30 = vadd.f32 %v4568_v19, %v1453_v28  ;;  %v1313_v34 = vadd.f32 %v4563_v15, %v1272_v27 }
 0xa99   :  { %v1514_v35 = vmax.f32 %v1498_v30, 0.0  ;;  %4099 = vmatpush3.bf16.msra.mxu1 %v4098_v29  ;;  %v1329_v40 = vmax.f32 %v1313_v34, 0.0 }
 0xa9a   :  { %v1458_v36 = vpop.permute.xlu0 %1457  ;;  %v1277_v6 = vpop.permute.xlu1 %1276  ;;  %4100 = vmatprep.subr.bf16.mxu1 %v4354_v21 }
 0xa9b   :  { %v4122_v4 = vpack.c.bf16 %v1514_v35, %v1513_v31  ;;  %v1314_v39 = vadd.f32 %v4563_v15, %v1277_v6  ;;  %v1499_v41 = vadd.f32 %v4568_v19, %v1458_v36  ;;  %v45_v35 = vld [vmem:[%s4851_s3 + $0x68] sm:$0xff]  ;;  %v46_v36 = vld [vmem:[%s4851_s3 + $0x70] sm:$0xff]  ;;  %v44_v6 = vld [vmem:[%s4851_s3 + $0x60] sm:$0xff] }
 0xa9d   :  { %v1330_v42 = vmax.f32 %v1314_v39, 0.0  ;;  %4123 = vmatpush3.bf16.msra.mxu0 %v4122_v4  ;;  %v1515_v47 = vmax.f32 %v1499_v41, 0.0 }
 0xa9e   :  { %v1282_v43 = vpop.permute.xlu0 %1281  ;;  %v1463_v44 = vpop.permute.xlu1 %1462  ;;  %4124 = vmatprep.subr.bf16.mxu0 %v4354_v21 }
 0xa9f   :  { %v4101_v45 = vpack.c.bf16 %v1330_v42, %v1329_v40  ;;  %v1500_v46 = vadd.f32 %v4568_v19, %v1463_v44  ;;  %v1315_v48 = vadd.f32 %v4563_v15, %v1282_v43 }
 0xaa1   :  { %v1516_v50 = vmax.f32 %v1500_v46, 0.0  ;;  %4102 = vmatpush3.bf16.msra.mxu1 %v4101_v45  ;;  %v1331_v57 = vmax.f32 %v1315_v48, 0.0 }
 0xaa2   :  { %v1468_v52 = vpop.permute.xlu0 %1467  ;;  %v1287_v53 = vpop.permute.xlu1 %1286  ;;  %4103 = vmatprep.subr.bf16.mxu1 %v4354_v21 }
 0xaa3   :  { %v4125_v54 = vpack.c.bf16 %v1516_v50, %v1515_v47  ;;  %v1316_v56 = vadd.f32 %v4563_v15, %v1287_v53  ;;  %v1501_v51 = vadd.f32 %v4568_v19, %v1468_v52 }
 0xaa5   :  { %v1332_v58 = vmax.f32 %v1316_v56, 0.0  ;;  %4126 = vmatpush3.bf16.msra.mxu0 %v4125_v54  ;;  %v1517_v10 = vmax.f32 %v1501_v51, 0.0 }
 0xaa6   :  { %v1473_v59 = vpop.permute.xlu1 %1472  ;;  %4127 = vmatprep.subr.bf16.mxu0 %v4354_v21 }
 0xaa7   :  { %v4104_v60 = vpack.c.bf16 %v1332_v58, %v1331_v57  ;;  %v1502_v61 = vadd.f32 %v4568_v19, %v1473_v59  ;;  %v1478_v8 = vpop.permute.xlu0 %1477 }
 0xaa8   :  { %v1503_v63 = vadd.f32 %v4568_v19, %v1478_v8 }
 0xaa9   :  { %v1518_v62 = vmax.f32 %v1502_v61, 0.0  ;;  %4105 = vmatpush3.bf16.msra.mxu1 %v4104_v60  ;;  %v1712_v60 = vld [vmem:[#allocation2 + $0x1e0] sm:$0x3f] }
 0xaaa   :  { %4106 = vmatprep.subr.bf16.mxu1 %v4354_v21  ;;  %v1519_v5 = vmax.f32 %v1503_v63, 0.0 }
 0xaab   :  { %v4128_v0 = vpack.c.bf16 %v1518_v62, %v1517_v10  ;;  %v1292_v1 = vpop.permute.xlu0 %1291  ;;  %v1483_v2 = vpop.permute.xlu1 %1482 }
 0xaac   :  { %v1504_v3 = vadd.f32 %v4568_v19, %v1483_v2  ;;  %v1317_v14 = vadd.f32 %v4563_v15, %v1292_v1 }
 0xaad   :  { %4129 = vmatpush3.bf16.msra.mxu0 %v4128_v0 }
 0xaae   :  { %v1520_v7 = vmax.f32 %v1504_v3, 0.0  ;;  %4130 = vmatprep.subr.bf16.mxu0 %v4354_v21  ;;  %v1333_v16 = vmax.f32 %v1317_v14, 0.0 }
 0xaaf   :  { %v1297_v9 = vpop.permute.xlu1 %1296 }
 0xab0   :  { %v4131_v11 = vpack.c.bf16 %v1520_v7, %v1519_v5  ;;  %v1318_v13 = vadd.f32 %v4563_v15, %v1297_v9 }
 0xab2   :  { %v1334_v17 = vmax.f32 %v1318_v13, 0.0  ;;  %4132 = vmatpush3.bf16.msra.mxu0 %v4131_v11 }
 0xab3   :  { %4157 = vmatprep.subr.bf16.mxu0 %v4354_v21 }
 0xab4   :  { %v4107_v18 = vpack.c.bf16 %v1334_v17, %v1333_v16 }
 0xab5   :  { %3774 = vmatmul.mubr.f32.vlgmr.msra.gmra.mrb[6].mxu0 %v4554_v38  ;;  %v1596_v38 = vpop.permute.xlu0 %1595 }
 0xab6   :  { %4108 = vmatpush3.bf16.msra.mxu1 %v4107_v18  ;;  %3843 = vmatprep.mubr.msk.f32.mxu0 %vm4355_vm3, %v4353_v55 }
 0xab9   :  { %3739 = vmatmul.mubr.f32.vlgmr.msra.gmra.mrb[10].mxu1 %v4552_v37 }
 0xaba   :  { %1671 = vmatprep.mubr.f32.mxu1 %v4353_v55 }
 0xb88   :  { %v1587_v19 = vpop.f32.mrb[6].mxu0 }
 0xb89   :  { %v1592_v20 = vmul.f32 0.0078125, %v1587_v19  ;;  %v3775_v22 = vpop.f32.mrb[7].mxu0 }
 0xb8b   :  { %3350 = vmatprep.subr.msk.mxu1 %vm956_vm4, %v1592_v20 }
 0xb8c   :  { %v1401_v15 = vpop.f32.mrb[10].mxu1 }
 0xb8d   :  { %v1591_v23 = vmul.f32 0.0078125, %v1401_v15  ;;  %v3740_v24 = vpop.f32.mrb[11].mxu1 }
 0xb8f   :  { %3351 = vmatpush1.msk.msra.mxu1 %vm956_vm4, %v1591_v23 }
 0xb90   :  { %3352 = vmatmul.mubr.msk.f32.vlgmr.msra.gmra.mrb[12].mxu1 %vm952_vm5, %v1069_v25 }
 0xb91   :  { %1786 = vmatprep.mubr.f32.mxu1 %v4353_v55 }
 0xc63   :  { %v1673_v26 = vpop.f32.mrb[12].mxu1 }
 0xc64   :  { %v1674_v37 = vadd.f32 %v1673_v26, %v1596_v38  ;;  %v1675_v27 = vpop.f32.mrb[13].mxu1 }
 0xc65   :  { %v1676_v28 = vadd.f32 %v1675_v27, %v1596_v38 }
 0xc66   :  { %v1682_v29 = vmul.f32 %v1674_v37, %v1674_v37 }
 0xc67   :  { %v1683_v30 = vmul.f32 %v1676_v28, %v1676_v28  ;;  %v1678_v31 = vadd.f32 %v1676_v28, %v1674_v37 }
 0xc69   :  { %1679 = vadd.xlane.f32.xlu1 %v1678_v31  ;;  %v1684_v34 = vadd.f32 %v1683_v30, %v1682_v29 }
 0xc6b   :  { %1685 = vadd.xlane.f32.xlu0 %v1684_v34 }
 0xc7a   :  { %1705 = vperm.xlu1 %4292, %v45_v35  }
 0xc7e   :  { %1716 = vperm.xlu1 %4292, %v46_v36  }
 0xc81   :  { %1698 = vperm.xlu0 %4293, %v44_v6  }
 0xcf6   :  { %v1680_v4 = vpop.xlane.xlu1 %1679 }
 0xcf7   :  { %v1681_v39 = vmul.f32 0.00390625, %v1680_v4  ;;  %v47_v4 = vld [vmem:[%s4851_s3 + $0x78] sm:$0xff] }
 0xcf8   :  { %v1686_v40 = vpop.xlane.xlu0 %1685 }
 0xcf9   :  { %v1687_v41 = vmul.f32 0.00390625, %v1686_v40  ;;  %v1688_v42 = vmul.f32 %v1681_v39, %v1681_v39  ;;  %v1692_v45 = vsub.f32 %v1674_v37, %v1681_v39  ;;  %v1693_v46 = vsub.f32 %v1676_v28, %v1681_v39 }
 0xcfa   :  { %v1706_v56 = vpop.permute.xlu1 %1705 }
 0xcfb   :  { %v1689_v43 = vsub.f32 %v1687_v41, %v1688_v42 }
 0xcfd   :  { %v1690_v44 = vadd.f32 1e-05, %v1689_v43 }
 0xcfe   :  { %v1717_v61 = vpop.permute.xlu1 %1716 }
 0xcff   :  { %4308 = vrsqrt.f32 %v1690_v44 }
 0xd00   :  { %v1699_v52 = vpop.permute.xlu0 %1698 }
 0xd09   :  { %v4309_v47 = vpop.eup %4308 }
 0xd0a   :  { %v1694_v48 = vmul.f32 %v4309_v47, %v1692_v45  ;;  %v1695_v50 = vmul.f32 %v4309_v47, %v1693_v46 }
 0xd0c   :  { %v1701_v53 = vmul.f32 %v1699_v52, %v1694_v48  ;;  %v1702_v54 = vmul.f32 %v1699_v52, %v1695_v50 }
 0xd0e   :  { %v1708_v57 = vadd.f32 %v1706_v56, %v1701_v53  ;;  %v1709_v51 = vadd.f32 %v1706_v56, %v1702_v54 }
 0xd10   :  { %v4635_v58 = vadd.f32 %v1708_v57, %v4541_v32  ;;  %v4638_v59 = vadd.f32 %v1709_v51, %v4544_v33 }
 0xd12   :  { %1722 = vmatprep.subr.mxu1 %v4638_v59 }
 0xd13   :  { %1723 = vmatpush1.msra.mxu1 %v4635_v58 }
 0xd14   :  { %3353 = vmatmul.mubr.msk.f32.vlgmr.msra.gmra.mrb[14].mxu1 %vm428_vm2, %v1712_v60  ;;  %4133 = vmatprep.subr.bf16.mxu1 %v4354_v21 }
 0xd15   :  { %3808 = vmatprep.mubr.msk.f32.mxu1 %vm4355_vm3, %v4353_v55 }
 0xde7   :  { %v1788_v8 = vpop.f32.mrb[14].mxu1 }
 0xde8   :  { %v4646_v10 = vadd.f32 %v1788_v8, %v1717_v61  ;;  %v1790_v32 = vpop.f32.mrb[15].mxu1 }
 0xde9   :  { %v4648_v62 = vadd.f32 %v1790_v32, %v1717_v61 }
 0xdea   :  { %v1795_v33 = vrot.slane %v4646_v10, 5  ;;  %v4657_v40 = vrot.slane %v4646_v10, %v4465_v49 }
 0xdeb   :  { %v1796_v63 = vrot.slane %v4648_v62, 5  ;;  %v4662_v44 = vrot.slane %v4648_v62, %v4465_v49 }
 0xdec   :  { %1799 = vxpose.xlu1.b32.start.end [1/1] (short) %v1795_v33, 128 }
 0xded   :  { %1831 = vxpose.xlu0.b32.start.end [1/1] (short) %v1796_v63, 128 }
 0xe6c   :  { %v1815_v0 = vpop.trf.xlu1 }
 0xe6d   :  { %v1847_v1 = vpop.trf.xlu0  ;;  %1865 = vperm.xlu0 %4293, %v1815_v0  }
 0xe70   :  { %v1816_v2 = vpop.trf.xlu1 }
 0xe71   :  { %v1848_v3 = vpop.trf.xlu0  ;;  %2051 = vperm.xlu0 %4293, %v1847_v1   ;;  %1870 = vperm.xlu1 %4292, %v1816_v2  }
 0xe74   :  { %v1817_v5 = vpop.trf.xlu1 }
 0xe75   :  { %v1849_v14 = vpop.trf.xlu0  ;;  %2056 = vperm.xlu1 %4292, %v1848_v3   ;;  %1875 = vperm.xlu0 %4293, %v1817_v5  }
 0xe78   :  { %v1818_v7 = vpop.trf.xlu1 }
 0xe79   :  { %v1850_v9 = vpop.trf.xlu0  ;;  %2061 = vperm.xlu0 %4293, %v1849_v14   ;;  %1880 = vperm.xlu1 %4292, %v1818_v7  }
 0xe7c   :  { %v1819_v11 = vpop.trf.xlu1 }
 0xe7d   :  { %v1851_v13 = vpop.trf.xlu0  ;;  %2066 = vperm.xlu1 %4292, %v1850_v9   ;;  %1885 = vperm.xlu0 %4293, %v1819_v11  }
 0xe80   :  { %v1820_v16 = vpop.trf.xlu1 }
 0xe81   :  { %v1852_v17 = vpop.trf.xlu0  ;;  %2071 = vperm.xlu0 %4293, %v1851_v13   ;;  %1890 = vperm.xlu1 %4292, %v1820_v16  }
 0xe84   :  { %v1821_v18 = vpop.trf.xlu1 }
 0xe85   :  { %v1853_v19 = vpop.trf.xlu0  ;;  %2076 = vperm.xlu1 %4292, %v1852_v17   ;;  %1895 = vperm.xlu0 %4293, %v1821_v18  }
 0xe88   :  { %v1822_v20 = vpop.trf.xlu1 }
 0xe89   :  { %v1854_v22 = vpop.trf.xlu0  ;;  %2081 = vperm.xlu0 %4293, %v1853_v19   ;;  %1900 = vperm.xlu1 %4292, %v1822_v20  }
 0xe8c   :  { %v1823_v15 = vpop.trf.xlu1 }
 0xe8d   :  { %v1855_v23 = vpop.trf.xlu0  ;;  %2086 = vperm.xlu1 %4292, %v1854_v22   ;;  %1905 = vperm.xlu0 %4293, %v1823_v15  }
 0xe90   :  { %v1824_v24 = vpop.trf.xlu1 }
 0xe91   :  { %v1856_v25 = vpop.trf.xlu0  ;;  %2091 = vperm.xlu0 %4293, %v1855_v23   ;;  %1910 = vperm.xlu1 %4292, %v1824_v24  }
 0xe94   :  { %v1825_v38 = vpop.trf.xlu1 }
 0xe95   :  { %v1857_v26 = vpop.trf.xlu0  ;;  %2096 = vperm.xlu1 %4292, %v1856_v25   ;;  %1915 = vperm.xlu0 %4293, %v1825_v38  }
 0xe98   :  { %v1826_v37 = vpop.trf.xlu1 }
 0xe99   :  { %v1858_v27 = vpop.trf.xlu0  ;;  %2101 = vperm.xlu0 %4293, %v1857_v26   ;;  %1920 = vperm.xlu1 %4292, %v1826_v37  }
 0xe9c   :  { %v1827_v28 = vpop.trf.xlu1 }
 0xe9d   :  { %v1859_v29 = vpop.trf.xlu0  ;;  %2106 = vperm.xlu1 %4292, %v1858_v27   ;;  %1925 = vperm.xlu0 %4293, %v1827_v28  }
 0xea0   :  { %v1828_v30 = vpop.trf.xlu1 }
 0xea1   :  { %v1860_v31 = vpop.trf.xlu0  ;;  %2111 = vperm.xlu0 %4293, %v1859_v29   ;;  %1930 = vperm.xlu1 %4292, %v1828_v30  }
 0xea4   :  { %v1829_v35 = vpop.trf.xlu1 }
 0xea5   :  { %v1861_v34 = vpop.trf.xlu0  ;;  %2116 = vperm.xlu1 %4292, %v1860_v31  }
 0xea6   :  { %2121 = vperm.xlu0 %4293, %v1861_v34  }
 0xea8   :  { %v1830_v6 = vpop.trf.xlu1 }
 0xea9   :  { %v1862_v36 = vpop.trf.xlu0 }
 0xeaa   :  { %2126 = vperm.xlu1 %4292, %v1862_v36   ;;  %1935 = vperm.xlu0 %4293, %v1829_v35  }
 0xeae   :  { %2239 = vperm.xlu0 %4293, %v47_v4   ;;  %1940 = vperm.xlu1 %4292, %v1830_v6  }
 0xeec   :  { %v1866_v39 = vpop.permute.xlu0 %1865 }
 0xeed   :  { %v1947_v41 = vadd.f32 %v4657_v40, %v1866_v39 }
 0xeef   :  { %v1963_v46 = vmax.f32 %v1947_v41, 0.0 }
 0xef0   :  { %v2052_v42 = vpop.permute.xlu0 %2051  ;;  %v1871_v43 = vpop.permute.xlu1 %1870 }
 0xef1   :  { %v1948_v45 = vadd.f32 %v4657_v40, %v1871_v43  ;;  %v2133_v47 = vadd.f32 %v4662_v44, %v2052_v42 }
 0xef3   :  { %v1964_v48 = vmax.f32 %v1948_v45, 0.0  ;;  %v2149_v56 = vmax.f32 %v2133_v47, 0.0 }
 0xef4   :  { %v1876_v50 = vpop.permute.xlu0 %1875  ;;  %v2057_v52 = vpop.permute.xlu1 %2056 }
 0xef5   :  { %v4134_v53 = vpack.c.bf16 %v1964_v48, %v1963_v46  ;;  %v2134_v54 = vadd.f32 %v4662_v44, %v2057_v52  ;;  %v1949_v57 = vadd.f32 %v4657_v40, %v1876_v50 }
 0xef7   :  { %v2150_v51 = vmax.f32 %v2134_v54, 0.0  ;;  %4135 = vmatpush3.bf16.msra.mxu1 %v4134_v53  ;;  %v1965_v33 = vmax.f32 %v1949_v57, 0.0 }
 0xef8   :  { %v2062_v60 = vpop.permute.xlu0 %2061  ;;  %v1881_v61 = vpop.permute.xlu1 %1880  ;;  %4136 = vmatprep.subr.bf16.mxu1 %v4354_v21 }
 0xef9   :  { %v4158_v8 = vpack.c.bf16 %v2150_v51, %v2149_v56  ;;  %v1950_v32 = vadd.f32 %v4657_v40, %v1881_v61  ;;  %v2135_v63 = vadd.f32 %v4662_v44, %v2062_v60 }
 0xefb   :  { %v1966_v0 = vmax.f32 %v1950_v32, 0.0  ;;  %4159 = vmatpush3.bf16.msra.mxu0 %v4158_v8  ;;  %v2151_v14 = vmax.f32 %v2135_v63, 0.0 }
 0xefc   :  { %v1886_v1 = vpop.permute.xlu0 %1885  ;;  %v2067_v2 = vpop.permute.xlu1 %2066  ;;  %4160 = vmatprep.subr.bf16.mxu0 %v4354_v21 }
 0xefd   :  { %v4137_v3 = vpack.c.bf16 %v1966_v0, %v1965_v33  ;;  %v2136_v5 = vadd.f32 %v4662_v44, %v2067_v2  ;;  %v1951_v7 = vadd.f32 %v4657_v40, %v1886_v1 }
 0xeff   :  { %v2152_v9 = vmax.f32 %v2136_v5, 0.0  ;;  %4138 = vmatpush3.bf16.msra.mxu1 %v4137_v3  ;;  %v1967_v18 = vmax.f32 %v1951_v7, 0.0 }
 0xf00   :  { %v2072_v11 = vpop.permute.xlu0 %2071  ;;  %v1891_v13 = vpop.permute.xlu1 %1890  ;;  %4139 = vmatprep.subr.bf16.mxu1 %v4354_v21 }
 0xf01   :  { %v4161_v16 = vpack.c.bf16 %v2152_v9, %v2151_v14  ;;  %v1952_v17 = vadd.f32 %v4657_v40, %v1891_v13  ;;  %v2137_v19 = vadd.f32 %v4662_v44, %v2072_v11 }
 0xf03   :  { %v1968_v20 = vmax.f32 %v1952_v17, 0.0  ;;  %4162 = vmatpush3.bf16.msra.mxu0 %v4161_v16  ;;  %v2153_v25 = vmax.f32 %v2137_v19, 0.0 }
 0xf04   :  { %v1896_v22 = vpop.permute.xlu0 %1895  ;;  %v2077_v15 = vpop.permute.xlu1 %2076  ;;  %4163 = vmatprep.subr.bf16.mxu0 %v4354_v21 }
 0xf05   :  { %v4140_v23 = vpack.c.bf16 %v1968_v20, %v1967_v18  ;;  %v2138_v24 = vadd.f32 %v4662_v44, %v2077_v15  ;;  %v1953_v38 = vadd.f32 %v4657_v40, %v1896_v22 }
 0xf07   :  { %v2154_v26 = vmax.f32 %v2138_v24, 0.0  ;;  %4141 = vmatpush3.bf16.msra.mxu1 %v4140_v23  ;;  %v1969_v30 = vmax.f32 %v1953_v38, 0.0 }
 0xf08   :  { %v2082_v37 = vpop.permute.xlu0 %2081  ;;  %v1901_v27 = vpop.permute.xlu1 %1900  ;;  %4142 = vmatprep.subr.bf16.mxu1 %v4354_v21 }
 0xf09   :  { %v4164_v28 = vpack.c.bf16 %v2154_v26, %v2153_v25  ;;  %v1954_v29 = vadd.f32 %v4657_v40, %v1901_v27  ;;  %v2139_v31 = vadd.f32 %v4662_v44, %v2082_v37 }
 0xf0b   :  { %v1970_v34 = vmax.f32 %v1954_v29, 0.0  ;;  %4165 = vmatpush3.bf16.msra.mxu0 %v4164_v28  ;;  %v2155_v39 = vmax.f32 %v2139_v31, 0.0 }
 0xf0c   :  { %v1906_v35 = vpop.permute.xlu0 %1905  ;;  %v2087_v36 = vpop.permute.xlu1 %2086  ;;  %4166 = vmatprep.subr.bf16.mxu0 %v4354_v21 }
 0xf0d   :  { %v4143_v6 = vpack.c.bf16 %v1970_v34, %v1969_v30  ;;  %v2140_v4 = vadd.f32 %v4662_v44, %v2087_v36  ;;  %v1955_v41 = vadd.f32 %v4657_v40, %v1906_v35 }
 0xf0f   :  { %v2156_v42 = vmax.f32 %v2140_v4, 0.0  ;;  %4144 = vmatpush3.bf16.msra.mxu1 %v4143_v6  ;;  %v1971_v48 = vmax.f32 %v1955_v41, 0.0 }
 0xf10   :  { %v2092_v43 = vpop.permute.xlu0 %2091  ;;  %v1911_v45 = vpop.permute.xlu1 %1910  ;;  %4145 = vmatprep.subr.bf16.mxu1 %v4354_v21 }
 0xf11   :  { %v4167_v46 = vpack.c.bf16 %v2156_v42, %v2155_v39  ;;  %v1956_v47 = vadd.f32 %v4657_v40, %v1911_v45  ;;  %v2141_v50 = vadd.f32 %v4662_v44, %v2092_v43 }
 0xf13   :  { %v1972_v52 = vmax.f32 %v1956_v47, 0.0  ;;  %4168 = vmatpush3.bf16.msra.mxu0 %v4167_v46  ;;  %v2157_v51 = vmax.f32 %v2141_v50, 0.0  ;;  %v1713_v50 = vld [vmem:[#allocation2 + $0x1e8] sm:$0xff] }
 0xf14   :  { %v1916_v53 = vpop.permute.xlu0 %1915  ;;  %v2097_v54 = vpop.permute.xlu1 %2096  ;;  %4169 = vmatprep.subr.bf16.mxu0 %v4354_v21 }
 0xf15   :  { %v4146_v56 = vpack.c.bf16 %v1972_v52, %v1971_v48  ;;  %v2142_v57 = vadd.f32 %v4662_v44, %v2097_v54  ;;  %v1957_v60 = vadd.f32 %v4657_v40, %v1916_v53 }
 0xf17   :  { %v2158_v61 = vmax.f32 %v2142_v57, 0.0  ;;  %4147 = vmatpush3.bf16.msra.mxu1 %v4146_v56  ;;  %v1973_v0 = vmax.f32 %v1957_v60, 0.0 }
 0xf18   :  { %v2102_v8 = vpop.permute.xlu0 %2101  ;;  %v1921_v32 = vpop.permute.xlu1 %1920  ;;  %4148 = vmatprep.subr.bf16.mxu1 %v4354_v21 }
 0xf19   :  { %v4170_v33 = vpack.c.bf16 %v2158_v61, %v2157_v51  ;;  %v1958_v63 = vadd.f32 %v4657_v40, %v1921_v32  ;;  %v2143_v1 = vadd.f32 %v4662_v44, %v2102_v8  ;;  %v49_v61 = vld [vmem:[%s4851_s3 + $0x88] sm:$0xff]  ;;  %v50_v8 = vld [vmem:[%s4851_s3 + $0x90] sm:$0xff]  ;;  %v48_v32 = vld [vmem:[%s4851_s3 + $0x80] sm:$0xff] }
 0xf1b   :  { %v1974_v2 = vmax.f32 %v1958_v63, 0.0  ;;  %4171 = vmatpush3.bf16.msra.mxu0 %v4170_v33  ;;  %v2159_v9 = vmax.f32 %v2143_v1, 0.0 }
 0xf1c   :  { %v1926_v3 = vpop.permute.xlu0 %1925  ;;  %v2107_v5 = vpop.permute.xlu1 %2106  ;;  %4172 = vmatprep.subr.bf16.mxu0 %v4354_v21 }
 0xf1d   :  { %v4149_v14 = vpack.c.bf16 %v1974_v2, %v1973_v0  ;;  %v2144_v7 = vadd.f32 %v4662_v44, %v2107_v5  ;;  %v1959_v11 = vadd.f32 %v4657_v40, %v1926_v3 }
 0xf1f   :  { %v2160_v13 = vmax.f32 %v2144_v7, 0.0  ;;  %4150 = vmatpush3.bf16.msra.mxu1 %v4149_v14  ;;  %v1975_v20 = vmax.f32 %v1959_v11, 0.0 }
 0xf20   :  { %v2112_v16 = vpop.permute.xlu0 %2111  ;;  %v1931_v17 = vpop.permute.xlu1 %1930  ;;  %4151 = vmatprep.subr.bf16.mxu1 %v4354_v21 }
 0xf21   :  { %v4173_v18 = vpack.c.bf16 %v2160_v13, %v2159_v9  ;;  %v1960_v19 = vadd.f32 %v4657_v40, %v1931_v17  ;;  %v2145_v22 = vadd.f32 %v4662_v44, %v2112_v16 }
 0xf23   :  { %v1976_v15 = vmax.f32 %v1960_v19, 0.0  ;;  %4174 = vmatpush3.bf16.msra.mxu0 %v4173_v18  ;;  %v2161_v26 = vmax.f32 %v2145_v22, 0.0 }
 0xf24   :  { %v2117_v23 = vpop.permute.xlu1 %2116  ;;  %4175 = vmatprep.subr.bf16.mxu0 %v4354_v21 }
 0xf25   :  { %v4152_v24 = vpack.c.bf16 %v1976_v15, %v1975_v20  ;;  %v2146_v25 = vadd.f32 %v4662_v44, %v2117_v23  ;;  %v2122_v38 = vpop.permute.xlu0 %2121 }
 0xf26   :  { %v2147_v27 = vadd.f32 %v4662_v44, %v2122_v38 }
 0xf27   :  { %v2162_v37 = vmax.f32 %v2146_v25, 0.0  ;;  %4153 = vmatpush3.bf16.msra.mxu1 %v4152_v24  ;;  %v2356_v24 = vld [vmem:[#allocation2 + $0x1f0] sm:$0x3f] }
 0xf28   :  { %4154 = vmatprep.subr.bf16.mxu1 %v4354_v21  ;;  %v2163_v34 = vmax.f32 %v2147_v27, 0.0 }
 0xf29   :  { %v4176_v28 = vpack.c.bf16 %v2162_v37, %v2161_v26  ;;  %v1936_v29 = vpop.permute.xlu0 %1935  ;;  %v2127_v30 = vpop.permute.xlu1 %2126 }
 0xf2a   :  { %v2148_v31 = vadd.f32 %v4662_v44, %v2127_v30  ;;  %v1961_v35 = vadd.f32 %v4657_v40, %v1936_v29 }
 0xf2b   :  { %4177 = vmatpush3.bf16.msra.mxu0 %v4176_v28 }
 0xf2c   :  { %v2164_v36 = vmax.f32 %v2148_v31, 0.0  ;;  %4178 = vmatprep.subr.bf16.mxu0 %v4354_v21  ;;  %v1977_v41 = vmax.f32 %v1961_v35, 0.0 }
 0xf2d   :  { %v1941_v6 = vpop.permute.xlu1 %1940 }
 0xf2e   :  { %v4179_v4 = vpack.c.bf16 %v2164_v36, %v2163_v34  ;;  %v1962_v39 = vadd.f32 %v4657_v40, %v1941_v6 }
 0xf30   :  { %v1978_v42 = vmax.f32 %v1962_v39, 0.0  ;;  %4180 = vmatpush3.bf16.msra.mxu0 %v4179_v4 }
 0xf31   :  { %4205 = vmatprep.subr.bf16.mxu0 %v4354_v21 }
 0xf32   :  { %v4155_v43 = vpack.c.bf16 %v1978_v42, %v1977_v41 }
 0xf33   :  { %3844 = vmatmul.mubr.f32.vlgmr.msra.gmra.mrb[8].mxu0 %v4648_v62  ;;  %v2240_v62 = vpop.permute.xlu0 %2239 }
 0xf34   :  { %4156 = vmatpush3.bf16.msra.mxu1 %v4155_v43  ;;  %3913 = vmatprep.mubr.msk.f32.mxu0 %vm4355_vm3, %v4353_v55 }
 0xf37   :  { %3809 = vmatmul.mubr.f32.vlgmr.msra.gmra.mrb[16].mxu1 %v4646_v10 }
 0xf38   :  { %2315 = vmatprep.mubr.f32.mxu1 %v4353_v55 }
0x1006   :  { %v2231_v44 = vpop.f32.mrb[8].mxu0 }
0x1007   :  { %v2236_v45 = vmul.f32 0.0078125, %v2231_v44  ;;  %v3845_v46 = vpop.f32.mrb[9].mxu0 }
0x1009   :  { %3354 = vmatprep.subr.msk.mxu1 %vm956_vm4, %v2236_v45 }
0x100a   :  { %v2045_v40 = vpop.f32.mrb[16].mxu1 }
0x100b   :  { %v2235_v47 = vmul.f32 0.0078125, %v2045_v40  ;;  %v3810_v48 = vpop.f32.mrb[17].mxu1 }
0x100d   :  { %3355 = vmatpush1.msk.msra.mxu1 %vm956_vm4, %v2235_v47 }
0x100e   :  { %3356 = vmatmul.mubr.msk.f32.vlgmr.msra.gmra.mrb[18].mxu1 %vm952_vm5, %v1713_v50 }
0x100f   :  { %2430 = vmatprep.mubr.f32.mxu1 %v4353_v55 }
0x10e1   :  { %v2317_v52 = vpop.f32.mrb[18].mxu1 }
0x10e2   :  { %v2318_v10 = vadd.f32 %v2317_v52, %v2240_v62  ;;  %v2319_v53 = vpop.f32.mrb[19].mxu1 }
0x10e3   :  { %v2320_v54 = vadd.f32 %v2319_v53, %v2240_v62 }
0x10e4   :  { %v2326_v56 = vmul.f32 %v2318_v10, %v2318_v10 }
0x10e5   :  { %v2327_v57 = vmul.f32 %v2320_v54, %v2320_v54  ;;  %v2322_v51 = vadd.f32 %v2320_v54, %v2318_v10 }
0x10e7   :  { %2323 = vadd.xlane.f32.xlu1 %v2322_v51  ;;  %v2328_v60 = vadd.f32 %v2327_v57, %v2326_v56 }
0x10e9   :  { %2329 = vadd.xlane.f32.xlu0 %v2328_v60 }
0x10f8   :  { %2349 = vperm.xlu1 %4292, %v49_v61  }
0x10fc   :  { %2360 = vperm.xlu1 %4292, %v50_v8  }
0x10ff   :  { %2342 = vperm.xlu0 %4293, %v48_v32  }
0x1174   :  { %v2324_v33 = vpop.xlane.xlu1 %2323 }
0x1175   :  { %v2325_v63 = vmul.f32 0.00390625, %v2324_v33  ;;  %v51_v33 = vld [vmem:[%s4851_s3 + $0x98] sm:$0xff] }
0x1176   :  { %v2330_v0 = vpop.xlane.xlu0 %2329 }
0x1177   :  { %v2331_v1 = vmul.f32 0.00390625, %v2330_v0  ;;  %v2332_v2 = vmul.f32 %v2325_v63, %v2325_v63  ;;  %v2336_v14 = vsub.f32 %v2318_v10, %v2325_v63  ;;  %v2337_v7 = vsub.f32 %v2320_v54, %v2325_v63 }
0x1178   :  { %v2350_v19 = vpop.permute.xlu1 %2349 }
0x1179   :  { %v2333_v3 = vsub.f32 %v2331_v1, %v2332_v2 }
0x117b   :  { %v2334_v5 = vadd.f32 1e-05, %v2333_v3 }
0x117c   :  { %v2361_v25 = vpop.permute.xlu1 %2360 }
0x117d   :  { %4310 = vrsqrt.f32 %v2334_v5 }
0x117e   :  { %v2343_v16 = vpop.permute.xlu0 %2342 }
0x1187   :  { %v4311_v9 = vpop.eup %4310 }
0x1188   :  { %v2338_v11 = vmul.f32 %v4311_v9, %v2336_v14  ;;  %v2339_v13 = vmul.f32 %v4311_v9, %v2337_v7 }
0x118a   :  { %v2345_v17 = vmul.f32 %v2343_v16, %v2338_v11  ;;  %v2346_v18 = vmul.f32 %v2343_v16, %v2339_v13 }
0x118c   :  { %v2352_v20 = vadd.f32 %v2350_v19, %v2345_v17  ;;  %v2353_v22 = vadd.f32 %v2350_v19, %v2346_v18 }
0x118e   :  { %v4729_v15 = vadd.f32 %v2352_v20, %v4635_v58  ;;  %v4732_v23 = vadd.f32 %v2353_v22, %v4638_v59 }
0x1190   :  { %2366 = vmatprep.subr.mxu1 %v4732_v23 }
0x1191   :  { %2367 = vmatpush1.msra.mxu1 %v4729_v15 }
0x1192   :  { %3357 = vmatmul.mubr.msk.f32.vlgmr.msra.gmra.mrb[20].mxu1 %vm428_vm2, %v2356_v24  ;;  %4181 = vmatprep.subr.bf16.mxu1 %v4354_v21 }
0x1193   :  { %3878 = vmatprep.mubr.msk.f32.mxu1 %vm4355_vm3, %v4353_v55 }
0x1265   :  { %v2432_v38 = vpop.f32.mrb[20].mxu1 }
0x1266   :  { %v4740_v26 = vadd.f32 %v2432_v38, %v2361_v25  ;;  %v2434_v58 = vpop.f32.mrb[21].mxu1 }
0x1267   :  { %v4742_v37 = vadd.f32 %v2434_v58, %v2361_v25 }
0x1268   :  { %v2439_v59 = vrot.slane %v4740_v26, 5  ;;  %v4751_v0 = vrot.slane %v4740_v26, %v4465_v49 }
0x1269   :  { %v2440_v27 = vrot.slane %v4742_v37, 5  ;;  %v4756_v5 = vrot.slane %v4742_v37, %v4465_v49 }
0x126a   :  { %2443 = vxpose.xlu1.b32.start.end [1/1] (short) %v2439_v59, 128 }
0x126b   :  { %2475 = vxpose.xlu0.b32.start.end [1/1] (short) %v2440_v27, 128 }
0x12ea   :  { %v2459_v28 = vpop.trf.xlu1 }
0x12eb   :  { %v2491_v29 = vpop.trf.xlu0  ;;  %2509 = vperm.xlu0 %4293, %v2459_v28  }
0x12ee   :  { %v2460_v30 = vpop.trf.xlu1 }
0x12ef   :  { %v2492_v31 = vpop.trf.xlu0  ;;  %2695 = vperm.xlu0 %4293, %v2491_v29   ;;  %2514 = vperm.xlu1 %4292, %v2460_v30  }
0x12f2   :  { %v2461_v34 = vpop.trf.xlu1 }
0x12f3   :  { %v2493_v35 = vpop.trf.xlu0  ;;  %2700 = vperm.xlu1 %4292, %v2492_v31   ;;  %2519 = vperm.xlu0 %4293, %v2461_v34  }
0x12f6   :  { %v2462_v36 = vpop.trf.xlu1 }
0x12f7   :  { %v2494_v6 = vpop.trf.xlu0  ;;  %2705 = vperm.xlu0 %4293, %v2493_v35   ;;  %2524 = vperm.xlu1 %4292, %v2462_v36  }
0x12fa   :  { %v2463_v4 = vpop.trf.xlu1 }
0x12fb   :  { %v2495_v39 = vpop.trf.xlu0  ;;  %2710 = vperm.xlu1 %4292, %v2494_v6   ;;  %2529 = vperm.xlu0 %4293, %v2463_v4  }
0x12fe   :  { %v2464_v41 = vpop.trf.xlu1 }
0x12ff   :  { %v2496_v42 = vpop.trf.xlu0  ;;  %2715 = vperm.xlu0 %4293, %v2495_v39   ;;  %2534 = vperm.xlu1 %4292, %v2464_v41  }
0x1302   :  { %v2465_v43 = vpop.trf.xlu1 }
0x1303   :  { %v2497_v44 = vpop.trf.xlu0  ;;  %2720 = vperm.xlu1 %4292, %v2496_v42   ;;  %2539 = vperm.xlu0 %4293, %v2465_v43  }
0x1306   :  { %v2466_v45 = vpop.trf.xlu1 }
0x1307   :  { %v2498_v46 = vpop.trf.xlu0  ;;  %2725 = vperm.xlu0 %4293, %v2497_v44   ;;  %2544 = vperm.xlu1 %4292, %v2466_v45  }
0x130a   :  { %v2467_v40 = vpop.trf.xlu1 }
0x130b   :  { %v2499_v47 = vpop.trf.xlu0  ;;  %2730 = vperm.xlu1 %4292, %v2498_v46   ;;  %2549 = vperm.xlu0 %4293, %v2467_v40  }
0x130e   :  { %v2468_v48 = vpop.trf.xlu1 }
0x130f   :  { %v2500_v50 = vpop.trf.xlu0  ;;  %2735 = vperm.xlu0 %4293, %v2499_v47   ;;  %2554 = vperm.xlu1 %4292, %v2468_v48  }
0x1312   :  { %v2469_v62 = vpop.trf.xlu1 }
0x1313   :  { %v2501_v52 = vpop.trf.xlu0  ;;  %2740 = vperm.xlu1 %4292, %v2500_v50   ;;  %2559 = vperm.xlu0 %4293, %v2469_v62  }
0x1316   :  { %v2470_v10 = vpop.trf.xlu1 }
0x1317   :  { %v2502_v53 = vpop.trf.xlu0  ;;  %2745 = vperm.xlu0 %4293, %v2501_v52   ;;  %2564 = vperm.xlu1 %4292, %v2470_v10  }
0x131a   :  { %v2471_v54 = vpop.trf.xlu1 }
0x131b   :  { %v2503_v56 = vpop.trf.xlu0  ;;  %2750 = vperm.xlu1 %4292, %v2502_v53   ;;  %2569 = vperm.xlu0 %4293, %v2471_v54  }
0x131e   :  { %v2472_v57 = vpop.trf.xlu1 }
0x131f   :  { %v2504_v51 = vpop.trf.xlu0  ;;  %2755 = vperm.xlu0 %4293, %v2503_v56   ;;  %2574 = vperm.xlu1 %4292, %v2472_v57  }
0x1322   :  { %v2473_v61 = vpop.trf.xlu1 }
0x1323   :  { %v2505_v60 = vpop.trf.xlu0  ;;  %2760 = vperm.xlu1 %4292, %v2504_v51  }
0x1324   :  { %2765 = vperm.xlu0 %4293, %v2505_v60  }
0x1326   :  { %v2474_v32 = vpop.trf.xlu1 }
0x1327   :  { %v2506_v8 = vpop.trf.xlu0 }
0x1328   :  { %2770 = vperm.xlu1 %4292, %v2506_v8   ;;  %2579 = vperm.xlu0 %4293, %v2473_v61  }
0x132c   :  { %2883 = vperm.xlu0 %4293, %v51_v33   ;;  %2584 = vperm.xlu1 %4292, %v2474_v32  }
0x136a   :  { %v2510_v63 = vpop.permute.xlu0 %2509 }
0x136b   :  { %v2591_v1 = vadd.f32 %v4751_v0, %v2510_v63 }
0x136d   :  { %v2607_v7 = vmax.f32 %v2591_v1, 0.0 }
0x136e   :  { %v2696_v2 = vpop.permute.xlu0 %2695  ;;  %v2515_v3 = vpop.permute.xlu1 %2514 }
0x136f   :  { %v2592_v14 = vadd.f32 %v4751_v0, %v2515_v3  ;;  %v2777_v9 = vadd.f32 %v4756_v5, %v2696_v2 }
0x1371   :  { %v2608_v11 = vmax.f32 %v2592_v14, 0.0  ;;  %v2793_v19 = vmax.f32 %v2777_v9, 0.0 }
0x1372   :  { %v2520_v13 = vpop.permute.xlu0 %2519  ;;  %v2701_v16 = vpop.permute.xlu1 %2700 }
0x1373   :  { %v4182_v17 = vpack.c.bf16 %v2608_v11, %v2607_v7  ;;  %v2778_v18 = vadd.f32 %v4756_v5, %v2701_v16  ;;  %v2593_v20 = vadd.f32 %v4751_v0, %v2520_v13 }
0x1375   :  { %v2794_v22 = vmax.f32 %v2778_v18, 0.0  ;;  %4183 = vmatpush3.bf16.msra.mxu1 %v4182_v17  ;;  %v2609_v59 = vmax.f32 %v2593_v20, 0.0 }
0x1376   :  { %v2706_v24 = vpop.permute.xlu0 %2705  ;;  %v2525_v25 = vpop.permute.xlu1 %2524  ;;  %4184 = vmatprep.subr.bf16.mxu1 %v4354_v21 }
0x1377   :  { %v4206_v38 = vpack.c.bf16 %v2794_v22, %v2793_v19  ;;  %v2594_v58 = vadd.f32 %v4751_v0, %v2525_v25  ;;  %v2779_v27 = vadd.f32 %v4756_v5, %v2706_v24 }
0x1379   :  { %v2610_v28 = vmax.f32 %v2594_v58, 0.0  ;;  %4207 = vmatpush3.bf16.msra.mxu0 %v4206_v38  ;;  %v2795_v35 = vmax.f32 %v2779_v27, 0.0 }
0x137a   :  { %v2530_v29 = vpop.permute.xlu0 %2529  ;;  %v2711_v30 = vpop.permute.xlu1 %2710  ;;  %4208 = vmatprep.subr.bf16.mxu0 %v4354_v21 }
0x137b   :  { %v4185_v31 = vpack.c.bf16 %v2610_v28, %v2609_v59  ;;  %v2780_v34 = vadd.f32 %v4756_v5, %v2711_v30  ;;  %v2595_v36 = vadd.f32 %v4751_v0, %v2530_v29 }
0x137d   :  { %v2796_v6 = vmax.f32 %v2780_v34, 0.0  ;;  %4186 = vmatpush3.bf16.msra.mxu1 %v4185_v31  ;;  %v2611_v43 = vmax.f32 %v2595_v36, 0.0 }
0x137e   :  { %v2716_v4 = vpop.permute.xlu0 %2715  ;;  %v2535_v39 = vpop.permute.xlu1 %2534  ;;  %4187 = vmatprep.subr.bf16.mxu1 %v4354_v21 }
0x137f   :  { %v4209_v41 = vpack.c.bf16 %v2796_v6, %v2795_v35  ;;  %v2596_v42 = vadd.f32 %v4751_v0, %v2535_v39  ;;  %v2781_v44 = vadd.f32 %v4756_v5, %v2716_v4 }
0x1381   :  { %v2612_v45 = vmax.f32 %v2596_v42, 0.0  ;;  %4210 = vmatpush3.bf16.msra.mxu0 %v4209_v41  ;;  %v2797_v50 = vmax.f32 %v2781_v44, 0.0 }
0x1382   :  { %v2540_v46 = vpop.permute.xlu0 %2539  ;;  %v2721_v40 = vpop.permute.xlu1 %2720  ;;  %4211 = vmatprep.subr.bf16.mxu0 %v4354_v21 }
0x1383   :  { %v4188_v47 = vpack.c.bf16 %v2612_v45, %v2611_v43  ;;  %v2782_v48 = vadd.f32 %v4756_v5, %v2721_v40  ;;  %v2597_v62 = vadd.f32 %v4751_v0, %v2540_v46 }
0x1385   :  { %v2798_v52 = vmax.f32 %v2782_v48, 0.0  ;;  %4189 = vmatpush3.bf16.msra.mxu1 %v4188_v47  ;;  %v2613_v57 = vmax.f32 %v2597_v62, 0.0 }
0x1386   :  { %v2726_v10 = vpop.permute.xlu0 %2725  ;;  %v2545_v53 = vpop.permute.xlu1 %2544  ;;  %4190 = vmatprep.subr.bf16.mxu1 %v4354_v21 }
0x1387   :  { %v4212_v54 = vpack.c.bf16 %v2798_v52, %v2797_v50  ;;  %v2598_v56 = vadd.f32 %v4751_v0, %v2545_v53  ;;  %v2783_v51 = vadd.f32 %v4756_v5, %v2726_v10 }
0x1389   :  { %v2614_v60 = vmax.f32 %v2598_v56, 0.0  ;;  %4213 = vmatpush3.bf16.msra.mxu0 %v4212_v54  ;;  %v2799_v63 = vmax.f32 %v2783_v51, 0.0 }
0x138a   :  { %v2550_v61 = vpop.permute.xlu0 %2549  ;;  %v2731_v8 = vpop.permute.xlu1 %2730  ;;  %4214 = vmatprep.subr.bf16.mxu0 %v4354_v21 }
0x138b   :  { %v4191_v32 = vpack.c.bf16 %v2614_v60, %v2613_v57  ;;  %v2784_v33 = vadd.f32 %v4756_v5, %v2731_v8  ;;  %v2599_v1 = vadd.f32 %v4751_v0, %v2550_v61 }
0x138d   :  { %v2800_v2 = vmax.f32 %v2784_v33, 0.0  ;;  %4192 = vmatpush3.bf16.msra.mxu1 %v4191_v32  ;;  %v2615_v11 = vmax.f32 %v2599_v1, 0.0 }
0x138e   :  { %v2736_v3 = vpop.permute.xlu0 %2735  ;;  %v2555_v14 = vpop.permute.xlu1 %2554  ;;  %4193 = vmatprep.subr.bf16.mxu1 %v4354_v21 }
0x138f   :  { %v4215_v7 = vpack.c.bf16 %v2800_v2, %v2799_v63  ;;  %v2600_v9 = vadd.f32 %v4751_v0, %v2555_v14  ;;  %v2785_v13 = vadd.f32 %v4756_v5, %v2736_v3 }
0x1391   :  { %v2616_v16 = vmax.f32 %v2600_v9, 0.0  ;;  %4216 = vmatpush3.bf16.msra.mxu0 %v4215_v7  ;;  %v2801_v22 = vmax.f32 %v2785_v13, 0.0  ;;  %v3000_v13 = vld [vmem:[#allocation2 + $0xe0] sm:$0xff] }
0x1392   :  { %v2560_v17 = vpop.permute.xlu0 %2559  ;;  %v2741_v18 = vpop.permute.xlu1 %2740  ;;  %4217 = vmatprep.subr.bf16.mxu0 %v4354_v21 }
0x1393   :  { %v4194_v19 = vpack.c.bf16 %v2616_v16, %v2615_v11  ;;  %v2786_v20 = vadd.f32 %v4756_v5, %v2741_v18  ;;  %v2601_v24 = vadd.f32 %v4751_v0, %v2560_v17 }
0x1395   :  { %v2802_v25 = vmax.f32 %v2786_v20, 0.0  ;;  %4195 = vmatpush3.bf16.msra.mxu1 %v4194_v19  ;;  %v2617_v28 = vmax.f32 %v2601_v24, 0.0 }
0x1396   :  { %v2746_v38 = vpop.permute.xlu0 %2745  ;;  %v2565_v58 = vpop.permute.xlu1 %2564  ;;  %4196 = vmatprep.subr.bf16.mxu1 %v4354_v21 }
0x1397   :  { %v4218_v59 = vpack.c.bf16 %v2802_v25, %v2801_v22  ;;  %v2602_v27 = vadd.f32 %v4751_v0, %v2565_v58  ;;  %v2787_v29 = vadd.f32 %v4756_v5, %v2746_v38  ;;  %v3002_v38 = vld [vmem:[#allocation2 + $0xf0] sm:$0xff]  ;;  %v3003_v58 = vld [vmem:[#allocation2 + $0xf8] sm:$0xff] }
0x1399   :  { %v2618_v30 = vmax.f32 %v2602_v27, 0.0  ;;  %4219 = vmatpush3.bf16.msra.mxu0 %v4218_v59  ;;  %v2803_v6 = vmax.f32 %v2787_v29, 0.0  ;;  %v4233_v59 = vpack.c.bf16 %v3003_v58, %v3002_v38  ;;  %v53_v27 = vld [vmem:[%s4851_s3 + $0xa8] sm:$0xff]  ;;  %v3135_v58 = vld [vmem:[#allocation2 + $0x170] sm:$0xff] }
0x139a   :  { %v2570_v31 = vpop.permute.xlu0 %2569  ;;  %v2751_v34 = vpop.permute.xlu1 %2750  ;;  %4220 = vmatprep.subr.bf16.mxu0 %v4354_v21  ;;  %v3005_v29 = vld [vmem:[#allocation2 + $0x108] sm:$0xff] }
0x139b   :  { %v4197_v35 = vpack.c.bf16 %v2618_v30, %v2617_v28  ;;  %v2788_v36 = vadd.f32 %v4756_v5, %v2751_v34  ;;  %v2603_v4 = vadd.f32 %v4751_v0, %v2570_v31  ;;  %v3004_v28 = vld [vmem:[#allocation2 + $0x100] sm:$0xff]  ;;  %v3006_v31 = vld [vmem:[#allocation2 + $0x110] sm:$0xff]  ;;  %v3007_v34 = vld [vmem:[#allocation2 + $0x118] sm:$0xff] }
0x139c   :  { %v4237_v30 = vpack.c.bf16 %v3005_v29, %v3004_v28  ;;  %v3137_v28 = vld [vmem:[#allocation2 + $0x180] sm:$0xff]  ;;  %v3138_v29 = vld [vmem:[#allocation2 + $0x188] sm:$0xff] }
0x139d   :  { %v2804_v39 = vmax.f32 %v2788_v36, 0.0  ;;  %4198 = vmatpush3.bf16.msra.mxu1 %v4197_v35  ;;  %v2619_v45 = vmax.f32 %v2603_v4, 0.0  ;;  %v4241_v35 = vpack.c.bf16 %v3007_v34, %v3006_v31  ;;  %v52_v36 = vld [vmem:[%s4851_s3 + $0xa0] sm:$0xff]  ;;  %v3009_v4 = vld [vmem:[#allocation2 + $0x128] sm:$0xff]  ;;  %v3139_v31 = vld [vmem:[#allocation2 + $0x190] sm:$0xff] }
0x139e   :  { %v2756_v41 = vpop.permute.xlu0 %2755  ;;  %v2575_v42 = vpop.permute.xlu1 %2574  ;;  %4199 = vmatprep.subr.bf16.mxu1 %v4354_v21  ;;  %v3140_v34 = vld [vmem:[#allocation2 + $0x198] sm:$0xff] }
0x139f   :  { %v4221_v43 = vpack.c.bf16 %v2804_v39, %v2803_v6  ;;  %v2604_v44 = vadd.f32 %v4751_v0, %v2575_v42  ;;  %v2789_v46 = vadd.f32 %v4756_v5, %v2756_v41  ;;  %v3008_v6 = vld [vmem:[#allocation2 + $0x120] sm:$0xff]  ;;  %v3010_v41 = vld [vmem:[#allocation2 + $0x130] sm:$0xff]  ;;  %v3011_v42 = vld [vmem:[#allocation2 + $0x138] sm:$0xff] }
0x13a0   :  { %v4245_v39 = vpack.c.bf16 %v3009_v4, %v3008_v6  ;;  %v3229_v6 = vld [vmem:[#allocation2 + $0x1a8] sm:$0xff] }
0x13a1   :  { %v2620_v40 = vmax.f32 %v2604_v44, 0.0  ;;  %4222 = vmatpush3.bf16.msra.mxu0 %v4221_v43  ;;  %v2805_v52 = vmax.f32 %v2789_v46, 0.0  ;;  %v4249_v43 = vpack.c.bf16 %v3011_v42, %v3010_v41  ;;  %v3012_v44 = vld [vmem:[#allocation2 + $0x140] sm:$0xff] }
0x13a2   :  { %v2761_v47 = vpop.permute.xlu1 %2760  ;;  %4223 = vmatprep.subr.bf16.mxu0 %v4354_v21 }
0x13a3   :  { %v4200_v48 = vpack.c.bf16 %v2620_v40, %v2619_v45  ;;  %v2790_v50 = vadd.f32 %v4756_v5, %v2761_v47  ;;  %v2766_v62 = vpop.permute.xlu0 %2765  ;;  %v3013_v45 = vld [vmem:[#allocation2 + $0x148] sm:$0xff]  ;;  %v3014_v40 = vld [vmem:[#allocation2 + $0x150] sm:$0xff]  ;;  %v3015_v47 = vld [vmem:[#allocation2 + $0x158] sm:$0xff] }
0x13a4   :  { %v2791_v53 = vadd.f32 %v4756_v5, %v2766_v62  ;;  %v4253_v46 = vpack.c.bf16 %v3013_v45, %v3012_v44 }
0x13a5   :  { %v2806_v10 = vmax.f32 %v2790_v50, 0.0  ;;  %4201 = vmatpush3.bf16.msra.mxu1 %v4200_v48  ;;  %v4257_v48 = vpack.c.bf16 %v3015_v47, %v3014_v40 }
0x13a6   :  { %4202 = vmatprep.subr.bf16.mxu1 %v4354_v21  ;;  %v2807_v60 = vmax.f32 %v2791_v53, 0.0 }
0x13a7   :  { %v4224_v54 = vpack.c.bf16 %v2806_v10, %v2805_v52  ;;  %v2580_v56 = vpop.permute.xlu0 %2579  ;;  %v2771_v57 = vpop.permute.xlu1 %2770 }
0x13a8   :  { %v2792_v51 = vadd.f32 %v4756_v5, %v2771_v57  ;;  %v2605_v61 = vadd.f32 %v4751_v0, %v2580_v56 }
0x13a9   :  { %4225 = vmatpush3.bf16.msra.mxu0 %v4224_v54 }
0x13aa   :  { %v2808_v8 = vmax.f32 %v2792_v51, 0.0  ;;  %4226 = vmatprep.subr.bf16.mxu0 %v4354_v21  ;;  %v2621_v1 = vmax.f32 %v2605_v61, 0.0 }
0x13ab   :  { %v2585_v32 = vpop.permute.xlu1 %2584 }
0x13ac   :  { %v4227_v33 = vpack.c.bf16 %v2808_v8, %v2807_v60  ;;  %v2606_v63 = vadd.f32 %v4751_v0, %v2585_v32  ;;  %v2357_v0 = vld [vmem:[#allocation2 + $0x1f8] sm:$0xff] }
0x13ae   :  { %v2622_v2 = vmax.f32 %v2606_v63, 0.0  ;;  %4228 = vmatpush3.bf16.msra.mxu0 %v4227_v33 }
0x13b0   :  { %v4203_v3 = vpack.c.bf16 %v2622_v2, %v2621_v1 }
0x13b1   :  { %3914 = vmatmul.mubr.f32.vlgmr.msra.gmra.mrb[10].mxu0 %v4742_v37  ;;  %v3001_v37 = vld [vmem:[#allocation2 + $0xe8] sm:$0xff] }
0x13b2   :  { %4204 = vmatpush3.bf16.msra.mxu1 %v4203_v3  ;;  %v4229_v16 = vpack.c.bf16 %v3001_v37, %v3000_v13 }
0x13b4   :  { %4230 = vmatprep.subr.bf16.mxu0 %v4229_v16 }
0x13b5   :  { %3879 = vmatmul.mubr.f32.vlgmr.msra.gmra.mrb[22].mxu1 %v4740_v26  ;;  %4232 = vmatpush3.bf16.msra.mxu0 %v4229_v16  ;;  %v2884_v26 = vpop.permute.xlu0 %2883 }
0x13b6   :  { %2959 = vmatprep.mubr.f32.mxu1 %v4353_v55  ;;  %4234 = vmatprep.subr.bf16.mxu0 %v4233_v59 }
0x13b9   :  { %4236 = vmatpush3.bf16.msra.mxu0 %v4233_v59  ;;  %v3136_v59 = vld [vmem:[#allocation2 + $0x178] sm:$0xff] }
0x13ba   :  { %4238 = vmatprep.subr.bf16.mxu0 %v4237_v30 }
0x13bd   :  { %4240 = vmatpush3.bf16.msra.mxu0 %v4237_v30  ;;  %v4269_v30 = vpack.c.bf16 %v3138_v29, %v3137_v28 }
0x13be   :  { %4242 = vmatprep.subr.bf16.mxu0 %v4241_v35 }
0x13c1   :  { %4244 = vmatpush3.bf16.msra.mxu0 %v4241_v35  ;;  %v4273_v35 = vpack.c.bf16 %v3140_v34, %v3139_v31 }
0x13c2   :  { %4246 = vmatprep.subr.bf16.mxu0 %v4245_v39 }
0x13c5   :  { %4248 = vmatpush3.bf16.msra.mxu0 %v4245_v39 }
0x13c6   :  { %4250 = vmatprep.subr.bf16.mxu0 %v4249_v43 }
0x13c9   :  { %4252 = vmatpush3.bf16.msra.mxu0 %v4249_v43 }
0x13ca   :  { %4254 = vmatprep.subr.bf16.mxu0 %v4253_v46 }
0x13cd   :  { %4256 = vmatpush3.bf16.msra.mxu0 %v4253_v46 }
0x13ce   :  { %4258 = vmatprep.subr.bf16.mxu0 %v4257_v48 }
0x13d1   :  { %4260 = vmatpush3.bf16.msra.mxu0 %v4257_v48 }
0x1484   :  { %v2875_v5 = vpop.f32.mrb[10].mxu0 }
0x1485   :  { %v2880_v14 = vmul.f32 0.0078125, %v2875_v5  ;;  %v3915_v7 = vpop.f32.mrb[11].mxu0 }
0x1486   :  { %v3018_v7 = vsub.s32 3, %v4407_v12 }
0x1487   :  { %3358 = vmatprep.subr.msk.mxu1 %vm956_vm4, %v2880_v14 }
0x1488   :  { %v2689_v21 = vpop.f32.mrb[22].mxu1 }
0x1489   :  { %v2879_v9 = vmul.f32 0.0078125, %v2689_v21  ;;  %v3880_v11 = vpop.f32.mrb[23].mxu1  ;;  %v4821_v21 = vld [vmem:[%s4850_s2] sm:$0xff] }
0x148b   :  { %3359 = vmatpush1.msk.msra.mxu1 %vm956_vm4, %v2879_v9  ;;  %v3019_v9 = vrot.slane %v4821_v21, %v3018_v7  ;;  %v3315_v7 = vsub.s32 5, %v4407_v12 }
0x148c   :  { %3360 = vmatmul.mubr.msk.f32.vlgmr.msra.gmra.mrb[24].mxu1 %vm952_vm5, %v2357_v0 }
0x155f   :  { %v2961_v55 = vpop.f32.mrb[24].mxu1 }
0x1560   :  { %v2962_v17 = vadd.f32 %v2961_v55, %v2884_v26  ;;  %v2963_v18 = vpop.f32.mrb[25].mxu1 }
0x1561   :  { %v2964_v19 = vadd.f32 %v2963_v18, %v2884_v26 }
0x1562   :  { %v2970_v20 = vmul.f32 %v2962_v17, %v2962_v17 }
0x1563   :  { %v2971_v22 = vmul.f32 %v2964_v19, %v2964_v19  ;;  %v2966_v24 = vadd.f32 %v2964_v19, %v2962_v17 }
0x1565   :  { %2967 = vadd.xlane.f32.xlu1 %v2966_v24  ;;  %v2972_v25 = vadd.f32 %v2971_v22, %v2970_v20  ;;  %v37_v20 = vld [vmem:[%s4851_s3 + $0x28] sm:$0xff]  ;;  %v36_v22 = vld [vmem:[%s4851_s3 + $0x20] sm:$0xff] }
0x1566   :  { %v3133_v24 = vld [vmem:[#allocation2 + $0x160] sm:$0xff] }
0x1567   :  { %2973 = vadd.xlane.f32.xlu0 %v2972_v25  ;;  %v3134_v25 = vld [vmem:[#allocation2 + $0x168] sm:$0xff] }
0x1568   :  { %v4261_v38 = vpack.c.bf16 %v3134_v25, %v3133_v24 }
0x156a   :  { %4262 = vmatprep.subr.bf16.mxu1 %v4261_v38 }
0x156b   :  { %4264 = vmatpush3.bf16.msra.mxu1 %v4261_v38 }
0x1576   :  { %2993 = vperm.xlu1 %4292, %v53_v27   ;;  %v4265_v27 = vpack.c.bf16 %v3136_v59, %v3135_v58 }
0x1578   :  { %4266 = vmatprep.subr.bf16.mxu1 %v4265_v27 }
0x1579   :  { %4268 = vmatpush3.bf16.msra.mxu1 %v4265_v27 }
0x157a   :  { %4270 = vmatprep.subr.bf16.mxu1 %v4269_v30 }
0x157d   :  { %2986 = vperm.xlu0 %4293, %v52_v36   ;;  %4272 = vmatpush3.bf16.msra.mxu1 %v4269_v30  ;;  %v3228_v36 = vld [vmem:[#allocation2 + $0x1a0] sm:$0xff] }
0x157e   :  { %4274 = vmatprep.subr.bf16.mxu1 %v4273_v35  ;;  %v4277_v4 = vpack.c.bf16 %v3229_v6, %v3228_v36 }
0x1581   :  { %4276 = vmatpush3.bf16.msra.mxu1 %v4273_v35 }
0x1582   :  { %4278 = vmatprep.subr.bf16.mxu1 %v4277_v4 }
0x15f2   :  { %v2968_v50 = vpop.xlane.xlu1 %2967 }
0x15f3   :  { %v2969_v62 = vmul.f32 0.00390625, %v2968_v50 }
0x15f4   :  { %v2974_v52 = vpop.xlane.xlu0 %2973 }
0x15f5   :  { %v2975_v10 = vmul.f32 0.00390625, %v2974_v52  ;;  %v2976_v53 = vmul.f32 %v2969_v62, %v2969_v62  ;;  %v2980_v57 = vsub.f32 %v2962_v17, %v2969_v62  ;;  %v2981_v51 = vsub.f32 %v2964_v19, %v2969_v62 }
0x15f6   :  { %v2994_v1 = vpop.permute.xlu1 %2993 }
0x15f7   :  { %v2977_v54 = vsub.f32 %v2975_v10, %v2976_v53 }
0x15f9   :  { %v2978_v56 = vadd.f32 1e-05, %v2977_v54 }
0x15fb   :  { %4312 = vrsqrt.f32 %v2978_v56 }
0x15fc   :  { %v2987_v32 = vpop.permute.xlu0 %2986 }
0x1605   :  { %v4313_v60 = vpop.eup %4312 }
0x1606   :  { %v2982_v61 = vmul.f32 %v4313_v60, %v2980_v57  ;;  %v2983_v8 = vmul.f32 %v4313_v60, %v2981_v51 }
0x1608   :  { %v2989_v33 = vmul.f32 %v2987_v32, %v2982_v61  ;;  %v2990_v63 = vmul.f32 %v2987_v32, %v2983_v8  ;;  %v3230_v61 = vld [vmem:[#allocation2 + $0x1b0] sm:$0xff]  ;;  %v3231_v8 = vld [vmem:[#allocation2 + $0x1b8] sm:$0xff] }
0x1609   :  { %v4281_v32 = vpack.c.bf16 %v3231_v8, %v3230_v61 }
0x160a   :  { %v2996_v2 = vadd.f32 %v2994_v1, %v2989_v33  ;;  %v2997_v3 = vadd.f32 %v2994_v1, %v2990_v63  ;;  %v3144_v33 = vrot.slane %v4821_v21, %v4465_v49 }
0x160c   :  { %v2999_v5 = vadd.f32 %v2997_v3, %v4732_v23  ;;  %v2998_v14 = vadd.f32 %v2996_v2, %v4729_v15 }
0x160e   :  { %3948 = vmatprep.mubr.f32.mxu0 %v2998_v14 }
0x160f   :  { %3949 = vmatmul.mubr.f32.vlgmr.msra.gmra.mrb[12].mxu0 %v2999_v5 }
0x16e2   :  { %v3950_v11 = vpop.f32.mrb[12].mxu0 }
0x16e3   :  { %v3092_v0 = vadd.f32 %v3950_v11, %v3019_v9  ;;  %v3086_v13 = vpop.f32.mrb[13].mxu0 }
0x16e4   :  { %v3087_v37 = vadd.f32 %v3086_v13, %v3019_v9  ;;  %v3316_v9 = vrot.slane %v4821_v21, %v3315_v7 }
0x16e5   :  { %v3102_v16 = vmul.f32 %v3092_v0, %v3092_v0  ;;  %v3096_v23 = vsel %vm146_vm1, %v3092_v0, 0.0 }
0x16e6   :  { %v3101_v26 = vmul.f32 %v3087_v37, %v3087_v37  ;;  %v3095_v15 = vsel %vm146_vm1, %v3087_v37, 0.0 }
0x16e7   :  { %v3097_v55 = vadd.f32 %v3096_v23, %v3095_v15  ;;  %v3104_v17 = vsel %vm146_vm1, %v3102_v16, 0.0 }
0x16e8   :  { %v3103_v18 = vsel %vm146_vm1, %v3101_v26, 0.0 }
0x16e9   :  { %3098 = vadd.xlane.f32.xlu1 %v3097_v55  ;;  %v3105_v19 = vadd.f32 %v3104_v17, %v3103_v18 }
0x16eb   :  { %3106 = vadd.xlane.f32.xlu0 %v3105_v19 }
0x16fa   :  { %3126 = vperm.xlu1 %4292, %v37_v20  }
0x1701   :  { %3119 = vperm.xlu0 %4293, %v36_v22  }
0x1776   :  { %v3099_v39 = vpop.xlane.xlu1 %3098 }
0x1777   :  { %v3100_v41 = vmul.f32 0.0078125, %v3099_v39 }
0x1778   :  { %v3107_v42 = vpop.xlane.xlu0 %3106 }
0x1779   :  { %v3108_v43 = vmul.f32 0.0078125, %v3107_v42  ;;  %v3109_v44 = vmul.f32 %v3100_v41, %v3100_v41  ;;  %v3113_v40 = vsub.f32 %v3087_v37, %v3100_v41  ;;  %v3114_v47 = vsub.f32 %v3092_v0, %v3100_v41 }
0x177a   :  { %v3127_v54 = vpop.permute.xlu1 %3126 }
0x177b   :  { %v3110_v45 = vsub.f32 %v3108_v43, %v3109_v44 }
0x177d   :  { %v3111_v46 = vadd.f32 1e-05, %v3110_v45 }
0x177f   :  { %4314 = vrsqrt.f32 %v3111_v46 }
0x1780   :  { %v3120_v52 = vpop.permute.xlu0 %3119 }
0x1789   :  { %v4315_v48 = vpop.eup %4314 }
0x178a   :  { %v3115_v50 = vmul.f32 %v4315_v48, %v3113_v40  ;;  %v3116_v62 = vmul.f32 %v4315_v48, %v3114_v47 }
0x178c   :  { %v3122_v10 = vmul.f32 %v3120_v52, %v3115_v50  ;;  %v3123_v53 = vmul.f32 %v3120_v52, %v3116_v62 }
0x178e   :  { %v3129_v56 = vadd.f32 %v3127_v54, %v3122_v10  ;;  %v3130_v57 = vadd.f32 %v3127_v54, %v3123_v53 }
0x1790   :  { %v3131_v51 = vmax.f32 %v3129_v56, 0.0  ;;  %v3132_v60 = vmax.f32 %v3130_v57, 0.0 }
0x1792   :  { %3967 = vmatprep.mubr.msk.f32.mxu1 %vm146_vm1, %v3131_v51 }
0x1793   :  { %3968 = vmatmul.mubr.msk.f32.vlgmr.msra.gmra.mrb[26].mxu1 %vm146_vm1, %v3132_v60 }
0x1794   :  { %4280 = vmatpush3.bf16.msra.mxu1 %v4277_v4 }
0x1795   :  { %4282 = vmatprep.subr.bf16.mxu1 %v4281_v32 }
0x1798   :  { %4284 = vmatpush3.bf16.msra.mxu1 %v4281_v32 }
0x1866   :  { %v3969_v63 = vpop.f32.mrb[26].mxu1 }
0x1867   :  { %v3223_v1 = vadd.f32 %v3969_v63, %v3144_v33  ;;  %v3217_v2 = vpop.f32.mrb[27].mxu1 }
0x1868   :  { %v3218_v3 = vadd.f32 %v3217_v2, %v3144_v33 }
0x1869   :  { %v3227_v14 = vmax.f32 %v3223_v1, 0.0 }
0x186a   :  { %v3226_v5 = vmax.f32 %v3218_v3, 0.0 }
0x186c   :  { %3978 = vmatprep.mubr.msk.f32.mxu1 %vm64_vm0, %v3226_v5 }
0x186d   :  { %3979 = vmatmul.mubr.msk.f32.vlgmr.msra.gmra.mrb[28].mxu1 %vm64_vm0, %v3227_v14 }
0x1940   :  { %v3980_v11 = vpop.f32.mrb[28].mxu1 }
0x1941   :  { %v3318_v0 = vadd.f32 %v3980_v11, %v3316_v9  ;;  %v3304_v13 = vpop.f32.mrb[29].mxu1 }
0x1942   :  { %v3317_v37 = vadd.f32 %v3316_v9, %v3304_v13 }
0x1943   :  { %v3366_v16 = vmul.f32 -1.442695, %v3318_v0 }
0x1944   :  { %v3365_v49 = vmul.f32 -1.442695, %v3317_v37 }
0x1945   :  { %4316 = vpow2.f32 %v3366_v16 }
0x1946   :  { %4318 = vpow2.f32 %v3365_v49 }
0x194f   :  { %v4317_v23 = vpop.eup %4316 }
0x1950   :  { %v4319_v26 = vpop.eup %4318  ;;  %v3326_v15 = vadd.f32 1.0, %v4317_v23 }
0x1951   :  { %v3325_v55 = vadd.f32 1.0, %v4319_v26 }
0x1952   :  { %4320 = vrcp.f32 %v3326_v15 }
0x1953   :  { %4322 = vrcp.f32 %v3325_v55 }
0x195c   :  { %v4321_v17 = vpop.eup %4320 }
0x195d   :  { %v4323_v18 = vpop.eup %4322  ;;  %3333 = vst.msk [vmem:[%s4852_s4 + $0x8] sm:$0xff] %vm3331_vm6, %v4321_v17 }
0x195e   :  { %3332 = vst.msk [vmem:[%s4852_s4] sm:$0xff] %vm3331_vm6, %v4323_v18 }
0x195f   :  { %3338 = vsyncpa [#allocation3], 1 }

</bundles_post_ra>
